<compile_context>
chip_gen: v6e
topology: v6e:2x2x1
jax: 0.10.0
libtpu: 0.0.40
codegen_flags: <defaults>
</compile_context>

<pallas_src>
import functools

import jax
import jax.numpy as jnp
from jax import lax
from jax.experimental import pallas as pl
from jax.experimental.pallas import tpu as pltpu


# ----------------------------------------------------------------------------
# Fused Controller-step kernel
# ----------------------------------------------------------------------------
def _controller_kernel(
    y_star_ref,   # (B, n)        target output y_
    yu_ref,       # (B, n+m)      [y_prev | u_prev]  (concatenated host-side)
    xi_ref,       # (B, n_xi)     controller state
    w_plant_ref,  # (n+m, n)      [Af^T ; Bf^T]            (example linear f)
    w_base_ref,   # (n_xi+n, l)   [C1^T ; D12^T] * (1/Lambda) per column
    d11s_ref,     # (l, l)        D11^T * (1/Lambda) per column
    w_out_ref,    # (n_xi+l+n, n_xi+m)  [[F^T,C2^T],[B1^T,D21^T],[B2^T,D22^T]]
    einv_ref,     # (n_xi, n_xi)  E^{-T}  (precomputed host-side)
    out_ref,      # (B, out_pad)  lane-dense slab: [xi_ | u_ | zero pad]
):
    dot = functools.partial(jnp.dot, precision=lax.Precision.HIGHEST,
                            preferred_element_type=jnp.float32)

    y_star = y_star_ref[...]
    xi = xi_ref[...]
    n_xi = xi.shape[1]

    # --- PsiX (example linear plant) + residual:  w = y_ - (y Af^T + u Bf^T)
    w = y_star - dot(yu_ref[...], w_plant_ref[...])              # (B, n)

    # --- PsiU epsilon solve.
    # x[:, i] holds (C1[i].xi + D11[i].eps + D12[i].w) / Lambda_i; the base
    # part comes from one fused MXU dot, the D11 part is accumulated with
    # rank-1 VPU updates (D11 strictly lower triangular forces the serial
    # order, but nothing in the chain touches the MXU).
    xw = jnp.concatenate([xi, w], axis=1)                        # (B, n_xi+n)
    x = dot(xw, w_base_ref[...])                                 # (B, l)
    d11s = d11s_ref[...]                                         # (l, l)
    bsz, l = x.shape

    # Identity rows for the eps column scatter, built once (no per-step iota).
    eye = (lax.broadcasted_iota(jnp.int32, (l, l), 0) ==
           lax.broadcasted_iota(jnp.int32, (l, l), 1)).astype(jnp.float32)

    eps = jnp.zeros((bsz, l), jnp.float32)
    for i in range(l):                           # static unroll (l is small)
        e_i = jnp.tanh(x[:, i:i + 1])            # (B, 1) static lane slice
        eps = eps + e_i * eye[i:i + 1, :]        # write column i (off-chain)
        if i + 1 < l:                            # last D11^T row is all zeros
            x = x + e_i * d11s[i:i + 1, :]       # rank-1 VPU update

    # --- [E xi_ | u_] = [xi | eps | w] @ block-stack ; then xi_ = (E xi_) E^{-T}
    xew = jnp.concatenate([xi, eps, w], axis=1)                  # (B, n_xi+l+n)
    exu = dot(xew, w_out_ref[...])                               # (B, n_xi+m)
    xi_new = dot(exu[:, :n_xi], einv_ref[...])                   # (B, n_xi)
    u_new = exu[:, n_xi:]                                        # (B, m)

    # Single lane-dense store (unmasked vst, one writeback DMA).
    pad = out_ref.shape[1] - (xi_new.shape[1] + u_new.shape[1])
    out_ref[...] = jnp.concatenate(
        [xi_new, u_new, jnp.zeros((bsz, pad), jnp.float32)], axis=1)


def controller_pallas(packed, t, y_star, xi, omega):
    """One Controller step. Returns (u_, xi_, omega_) like the PyTorch module."""
    del t  # the PyTorch module only forwards t to f; the example f ignores it.
    y_prev, u_prev = omega
    B, n = y_star.shape
    m = u_prev.shape[1]
    n_xi = xi.shape[1]
    out_pad = ((n_xi + m + 127) // 128) * 128

    # Host-side concat of the two plant inputs (one input DMA instead of two).
    yu = jnp.concatenate([y_prev, u_prev], axis=1)               # (B, n+m)

    args = (y_star, yu, xi,
            packed["w_plant_t"], packed["w_base_t"], packed["d11s_t"],
            packed["w_out_t"], packed["einv_t"])

    vmem = pl.BlockSpec(memory_space=pltpu.MemorySpace.VMEM)
    slab = pl.pallas_call(
        _controller_kernel,
        out_shape=jax.ShapeDtypeStruct((B, out_pad), jnp.float32),
        in_specs=[vmem] * len(args),
        out_specs=vmem,
    )(*args)

    xi_new = slab[:, :n_xi]
    u_new = slab[:, n_xi:n_xi + m]
    return u_new, xi_new, (y_star, u_new)


# ----------------------------------------------------------------------------
# Parameter construction (mirrors PsiU.__init__ / set_model_param) + packing
# ----------------------------------------------------------------------------
def init_params(key, n, m, n_xi, l, std=0.1, eps_reg=1e-3):
    ks = jax.random.split(key, 9)
    raw = {}
    raw["X"] = jax.random.normal(ks[0], (2 * n_xi + l, 2 * n_xi + l),
                                 jnp.float32) * std
    raw["Y"] = jax.random.normal(ks[1], (n_xi, n_xi), jnp.float32) * std
    raw["B2"] = jax.random.normal(ks[2], (n_xi, n), jnp.float32) * std
    raw["C2"] = jax.random.normal(ks[3], (m, n_xi), jnp.float32) * std
    raw["D21"] = jax.random.normal(ks[4], (m, l), jnp.float32) * std
    raw["D22"] = jax.random.normal(ks[5], (m, n), jnp.float32) * std
    raw["D12"] = jax.random.normal(ks[6], (l, n), jnp.float32) * std
    # Example linear plant f(t, y, u) = Af @ y + Bf @ u used by PsiX.
    raw["Af"] = jax.random.normal(ks[7], (n, n), jnp.float32) * std
    raw["Bf"] = jax.random.normal(ks[8], (n, m), jnp.float32) * std

    # set_model_param(): derive F, B1, E, Lambda, D11, C1 from X, Y.
    X, Y = raw["X"], raw["Y"]
    H = X.T @ X + eps_reg * jnp.eye(2 * n_xi + l, dtype=jnp.float32)
    H11 = H[:n_xi, :n_xi]
    H21 = H[n_xi:n_xi + l, :n_xi]
    H22 = H[n_xi:n_xi + l, n_xi:n_xi + l]
    H31 = H[n_xi + l:, :n_xi]
    H32 = H[n_xi + l:, n_xi:n_xi + l]
    H33 = H[n_xi + l:, n_xi + l:]
    raw["F"] = H31
    raw["B1"] = H32
    raw["E"] = 0.5 * (H11 + H33 + Y - Y.T)
    raw["Lambda"] = 0.5 * jnp.diag(H22)
    raw["D11"] = -jnp.tril(H22, k=-1)
    raw["C1"] = -H21

    # Kernel-ready packing: stacked & transposed weights, 1/Lambda folded into
    # the epsilon-recurrence weights, E^{-1} precomputed.
    lam_inv = (1.0 / raw["Lambda"]).reshape(1, l)
    packed = {
        "w_plant_t": jnp.concatenate([raw["Af"].T, raw["Bf"].T], axis=0),
        "w_base_t": jnp.concatenate([raw["C1"].T, raw["D12"].T],
                                    axis=0) * lam_inv,
        "d11s_t": raw["D11"].T * lam_inv,
        "w_out_t": jnp.block([[raw["F"].T, raw["C2"].T],
                              [raw["B1"].T, raw["D21"].T],
                              [raw["B2"].T, raw["D22"].T]]),
        "einv_t": jnp.linalg.inv(raw["E"]).T,
    }
    return raw, packed


# ----------------------------------------------------------------------------
# Pure-JAX reference (follows the PyTorch forward literally, batched over B)
# ----------------------------------------------------------------------------
def controller_ref(raw, t, y_star, xi, omega):
    del t
    y_prev, u_prev = omega
    psi_x = y_prev @ raw["Af"].T + u_prev @ raw["Bf"].T
    w = y_star - psi_x

    C1, D11, D12, Lam = raw["C1"], raw["D11"], raw["D12"], raw["Lambda"]
    l = Lam.shape[0]
    B = y_star.shape[0]
    eps = jnp.zeros((B, l), jnp.float32)
    v = xi @ C1[0, :] + w @ D12[0, :]
    eps = eps.at[:, 0].set(jnp.tanh(v / Lam[0]))
    for i in range(1, l):
        v = xi @ C1[i, :] + eps @ D11[i, :] + w @ D12[i, :]
        eps = eps.at[:, i].set(jnp.tanh(v / Lam[i]))

    e_xi = xi @ raw["F"].T + eps @ raw["B1"].T + w @ raw["B2"].T
    xi_ = e_xi @ jnp.linalg.inv(raw["E"]).T
    u_ = xi @ raw["C2"].T + eps @ raw["D21"].T + w @ raw["D22"].T
    return u_, xi_, (y_star, u_)


if __name__ == "__main__":
    # f32-accurate matmuls in the (eager) reference too, so the comparison is
    # not limited by bf16 MXU passes on either side.
    jax.config.update("jax_default_matmul_precision", "highest")

    key = jax.random.PRNGKey(0)
    k_p, k_y, k_xi, k_yp, k_up = jax.random.split(key, 5)

    # Small shapes consistent with the module (PsiX hints n=4, m=2); batch=8.
    n, m, n_xi, l, B = 4, 2, 32, 32, 8

    raw, packed = init_params(k_p, n, m, n_xi, l)

    y_star = jax.random.normal(k_y, (B, n), jnp.float32)    # y_
    xi = jax.random.normal(k_xi, (B, n_xi), jnp.float32)    # xi
    y_prev = jax.random.normal(k_yp, (B, n), jnp.float32)   # omega[0]
    u_prev = jax.random.normal(k_up, (B, m), jnp.float32)   # omega[1]
    t = 0.0

    fwd = jax.jit(
        lambda ys, x, yp, up: controller_pallas(packed, t, ys, x, (yp, up)))
    u_, xi_, omega_ = jax.block_until_ready(fwd(y_star, xi, y_prev, u_prev))

    u_ref, xi_ref, omega_ref = controller_ref(raw, t, y_star, xi,
                                              (y_prev, u_prev))

    assert u_.shape == (B, m), u_.shape
    assert xi_.shape == (B, n_xi), xi_.shape
    assert omega_[0].shape == (B, n) and omega_[1].shape == (B, m)

    err_u = float(jnp.max(jnp.abs(u_ - u_ref)))
    err_xi = float(jnp.max(jnp.abs(xi_ - xi_ref)))
    ref_mag = float(jnp.maximum(jnp.max(jnp.abs(u_ref)),
                                jnp.max(jnp.abs(xi_ref))))
    tol = 1e-3 + 1e-3 * ref_mag
    if max(err_u, err_xi) > tol:
        raise AssertionError(
            f"Pallas/reference mismatch: err_u={err_u} err_xi={err_xi} > {tol}")

    print("KERNEL_OK")
</pallas_src>

<mosaic_0001>
module attributes {stable_mosaic.version = 11 : i64} {
  func.func @_controller_kernel(%arg0: memref<8x4xf32, #tpu.memory_space<vmem>>, %arg1: memref<8x6xf32, #tpu.memory_space<vmem>>, %arg2: memref<8x32xf32, #tpu.memory_space<vmem>>, %arg3: memref<6x4xf32, #tpu.memory_space<vmem>>, %arg4: memref<36x32xf32, #tpu.memory_space<vmem>>, %arg5: memref<32x32xf32, #tpu.memory_space<vmem>>, %arg6: memref<68x34xf32, #tpu.memory_space<vmem>>, %arg7: memref<32x32xf32, #tpu.memory_space<vmem>>, %arg8: memref<8x128xf32, #tpu.memory_space<vmem>>) attributes {dimension_semantics = [], scalar_prefetch = 0 : i64, scratch_operands = 0 : i64, tpu.core_type = #tpu.core_type<tc>} {
    %c0 = arith.constant 0 : index
    %c0_0 = arith.constant 0 : index
    %0 = vector.load %arg0[%c0, %c0_0] : memref<8x4xf32, #tpu.memory_space<vmem>>, vector<8x4xf32>
    %c0_1 = arith.constant 0 : index
    %c0_2 = arith.constant 0 : index
    %1 = vector.load %arg2[%c0_1, %c0_2] : memref<8x32xf32, #tpu.memory_space<vmem>>, vector<8x32xf32>
    %c0_3 = arith.constant 0 : index
    %c0_4 = arith.constant 0 : index
    %2 = vector.load %arg1[%c0_3, %c0_4] : memref<8x6xf32, #tpu.memory_space<vmem>>, vector<8x6xf32>
    %c0_5 = arith.constant 0 : index
    %c0_6 = arith.constant 0 : index
    %3 = vector.load %arg3[%c0_5, %c0_6] : memref<6x4xf32, #tpu.memory_space<vmem>>, vector<6x4xf32>
    %cst = arith.constant dense<0.000000e+00> : vector<8x4xf32>
    %4 = tpu.matmul %2, %3, %cst {dimension_numbers = #tpu.dot_dimension_numbers<[1], [0], [0], [1], [0, 0, 1, 1], [], []>, precision = #tpu.contract_precision<fp32>} : vector<8x6xf32>, vector<6x4xf32>, vector<8x4xf32> -> vector<8x4xf32>
    %5 = arith.subf %0, %4 : vector<8x4xf32>
    %6 = tpu.concatenate %1, %5 in 1 : vector<8x32xf32>, vector<8x4xf32> -> vector<8x36xf32>
    %c0_7 = arith.constant 0 : index
    %c0_8 = arith.constant 0 : index
    %7 = vector.load %arg4[%c0_7, %c0_8] : memref<36x32xf32, #tpu.memory_space<vmem>>, vector<36x32xf32>
    %cst_9 = arith.constant dense<0.000000e+00> : vector<8x32xf32>
    %8 = tpu.matmul %6, %7, %cst_9 {dimension_numbers = #tpu.dot_dimension_numbers<[1], [0], [0], [1], [0, 0, 1, 1], [], []>, precision = #tpu.contract_precision<fp32>} : vector<8x36xf32>, vector<36x32xf32>, vector<8x32xf32> -> vector<8x32xf32>
    %c0_10 = arith.constant 0 : index
    %c0_11 = arith.constant 0 : index
    %9 = vector.load %arg5[%c0_10, %c0_11] : memref<32x32xf32, #tpu.memory_space<vmem>>, vector<32x32xf32>
    %10 = tpu.iota {dimensions = array<i32: 0>} : vector<32x32xi32>
    %11 = tpu.iota {dimensions = array<i32: 1>} : vector<32x32xi32>
    %12 = arith.cmpi eq, %10, %11 : vector<32x32xi32>
    %13 = arith.extui %12 : vector<32x32xi1> to vector<32x32xi32>
    %14 = arith.sitofp %13 : vector<32x32xi32> to vector<32x32xf32>
    %cst_12 = arith.constant 0.000000e+00 : f32
    %15 = vector.broadcast %cst_12 : f32 to vector<8x32xf32>
    %16 = vector.extract_strided_slice %8 {offsets = [0, 0], sizes = [8, 1], strides = [1, 1]} : vector<8x32xf32> to vector<8x1xf32>
    %17 = math.tanh %16 : vector<8x1xf32>
    %18 = vector.extract_strided_slice %14 {offsets = [0, 0], sizes = [1, 32], strides = [1, 1]} : vector<32x32xf32> to vector<1x32xf32>
    %19 = vector.broadcast %17 : vector<8x1xf32> to vector<8x32xf32>
    %20 = vector.broadcast %18 : vector<1x32xf32> to vector<8x32xf32>
    %21 = arith.mulf %19, %20 : vector<8x32xf32>
    %22 = arith.addf %15, %21 : vector<8x32xf32>
    %23 = vector.extract_strided_slice %9 {offsets = [0, 0], sizes = [1, 32], strides = [1, 1]} : vector<32x32xf32> to vector<1x32xf32>
    %24 = vector.broadcast %17 : vector<8x1xf32> to vector<8x32xf32>
    %25 = vector.broadcast %23 : vector<1x32xf32> to vector<8x32xf32>
    %26 = arith.mulf %24, %25 : vector<8x32xf32>
    %27 = arith.addf %8, %26 : vector<8x32xf32>
    %28 = vector.extract_strided_slice %27 {offsets = [0, 1], sizes = [8, 1], strides = [1, 1]} : vector<8x32xf32> to vector<8x1xf32>
    %29 = math.tanh %28 : vector<8x1xf32>
    %30 = vector.extract_strided_slice %14 {offsets = [1, 0], sizes = [1, 32], strides = [1, 1]} : vector<32x32xf32> to vector<1x32xf32>
    %31 = vector.broadcast %29 : vector<8x1xf32> to vector<8x32xf32>
    %32 = vector.broadcast %30 : vector<1x32xf32> to vector<8x32xf32>
    %33 = arith.mulf %31, %32 : vector<8x32xf32>
    %34 = arith.addf %22, %33 : vector<8x32xf32>
    %35 = vector.extract_strided_slice %9 {offsets = [1, 0], sizes = [1, 32], strides = [1, 1]} : vector<32x32xf32> to vector<1x32xf32>
    %36 = vector.broadcast %29 : vector<8x1xf32> to vector<8x32xf32>
    %37 = vector.broadcast %35 : vector<1x32xf32> to vector<8x32xf32>
    %38 = arith.mulf %36, %37 : vector<8x32xf32>
    %39 = arith.addf %27, %38 : vector<8x32xf32>
    %40 = vector.extract_strided_slice %39 {offsets = [0, 2], sizes = [8, 1], strides = [1, 1]} : vector<8x32xf32> to vector<8x1xf32>
    %41 = math.tanh %40 : vector<8x1xf32>
    %42 = vector.extract_strided_slice %14 {offsets = [2, 0], sizes = [1, 32], strides = [1, 1]} : vector<32x32xf32> to vector<1x32xf32>
    %43 = vector.broadcast %41 : vector<8x1xf32> to vector<8x32xf32>
    %44 = vector.broadcast %42 : vector<1x32xf32> to vector<8x32xf32>
    %45 = arith.mulf %43, %44 : vector<8x32xf32>
    %46 = arith.addf %34, %45 : vector<8x32xf32>
    %47 = vector.extract_strided_slice %9 {offsets = [2, 0], sizes = [1, 32], strides = [1, 1]} : vector<32x32xf32> to vector<1x32xf32>
    %48 = vector.broadcast %41 : vector<8x1xf32> to vector<8x32xf32>
    %49 = vector.broadcast %47 : vector<1x32xf32> to vector<8x32xf32>
    %50 = arith.mulf %48, %49 : vector<8x32xf32>
    %51 = arith.addf %39, %50 : vector<8x32xf32>
    %52 = vector.extract_strided_slice %51 {offsets = [0, 3], sizes = [8, 1], strides = [1, 1]} : vector<8x32xf32> to vector<8x1xf32>
    %53 = math.tanh %52 : vector<8x1xf32>
    %54 = vector.extract_strided_slice %14 {offsets = [3, 0], sizes = [1, 32], strides = [1, 1]} : vector<32x32xf32> to vector<1x32xf32>
    %55 = vector.broadcast %53 : vector<8x1xf32> to vector<8x32xf32>
    %56 = vector.broadcast %54 : vector<1x32xf32> to vector<8x32xf32>
    %57 = arith.mulf %55, %56 : vector<8x32xf32>
    %58 = arith.addf %46, %57 : vector<8x32xf32>
    %59 = vector.extract_strided_slice %9 {offsets = [3, 0], sizes = [1, 32], strides = [1, 1]} : vector<32x32xf32> to vector<1x32xf32>
    %60 = vector.broadcast %53 : vector<8x1xf32> to vector<8x32xf32>
    %61 = vector.broadcast %59 : vector<1x32xf32> to vector<8x32xf32>
    %62 = arith.mulf %60, %61 : vector<8x32xf32>
    %63 = arith.addf %51, %62 : vector<8x32xf32>
    %64 = vector.extract_strided_slice %63 {offsets = [0, 4], sizes = [8, 1], strides = [1, 1]} : vector<8x32xf32> to vector<8x1xf32>
    %65 = math.tanh %64 : vector<8x1xf32>
    %66 = vector.extract_strided_slice %14 {offsets = [4, 0], sizes = [1, 32], strides = [1, 1]} : vector<32x32xf32> to vector<1x32xf32>
    %67 = vector.broadcast %65 : vector<8x1xf32> to vector<8x32xf32>
    %68 = vector.broadcast %66 : vector<1x32xf32> to vector<8x32xf32>
    %69 = arith.mulf %67, %68 : vector<8x32xf32>
    %70 = arith.addf %58, %69 : vector<8x32xf32>
    %71 = vector.extract_strided_slice %9 {offsets = [4, 0], sizes = [1, 32], strides = [1, 1]} : vector<32x32xf32> to vector<1x32xf32>
    %72 = vector.broadcast %65 : vector<8x1xf32> to vector<8x32xf32>
    %73 = vector.broadcast %71 : vector<1x32xf32> to vector<8x32xf32>
    %74 = arith.mulf %72, %73 : vector<8x32xf32>
    %75 = arith.addf %63, %74 : vector<8x32xf32>
    %76 = vector.extract_strided_slice %75 {offsets = [0, 5], sizes = [8, 1], strides = [1, 1]} : vector<8x32xf32> to vector<8x1xf32>
    %77 = math.tanh %76 : vector<8x1xf32>
    %78 = vector.extract_strided_slice %14 {offsets = [5, 0], sizes = [1, 32], strides = [1, 1]} : vector<32x32xf32> to vector<1x32xf32>
    %79 = vector.broadcast %77 : vector<8x1xf32> to vector<8x32xf32>
    %80 = vector.broadcast %78 : vector<1x32xf32> to vector<8x32xf32>
    %81 = arith.mulf %79, %80 : vector<8x32xf32>
    %82 = arith.addf %70, %81 : vector<8x32xf32>
    %83 = vector.extract_strided_slice %9 {offsets = [5, 0], sizes = [1, 32], strides = [1, 1]} : vector<32x32xf32> to vector<1x32xf32>
    %84 = vector.broadcast %77 : vector<8x1xf32> to vector<8x32xf32>
    %85 = vector.broadcast %83 : vector<1x32xf32> to vector<8x32xf32>
    %86 = arith.mulf %84, %85 : vector<8x32xf32>
    %87 = arith.addf %75, %86 : vector<8x32xf32>
    %88 = vector.extract_strided_slice %87 {offsets = [0, 6], sizes = [8, 1], strides = [1, 1]} : vector<8x32xf32> to vector<8x1xf32>
    %89 = math.tanh %88 : vector<8x1xf32>
    %90 = vector.extract_strided_slice %14 {offsets = [6, 0], sizes = [1, 32], strides = [1, 1]} : vector<32x32xf32> to vector<1x32xf32>
    %91 = vector.broadcast %89 : vector<8x1xf32> to vector<8x32xf32>
    %92 = vector.broadcast %90 : vector<1x32xf32> to vector<8x32xf32>
    %93 = arith.mulf %91, %92 : vector<8x32xf32>
    %94 = arith.addf %82, %93 : vector<8x32xf32>
    %95 = vector.extract_strided_slice %9 {offsets = [6, 0], sizes = [1, 32], strides = [1, 1]} : vector<32x32xf32> to vector<1x32xf32>
    %96 = vector.broadcast %89 : vector<8x1xf32> to vector<8x32xf32>
    %97 = vector.broadcast %95 : vector<1x32xf32> to vector<8x32xf32>
    %98 = arith.mulf %96, %97 : vector<8x32xf32>
    %99 = arith.addf %87, %98 : vector<8x32xf32>
    %100 = vector.extract_strided_slice %99 {offsets = [0, 7], sizes = [8, 1], strides = [1, 1]} : vector<8x32xf32> to vector<8x1xf32>
    %101 = math.tanh %100 : vector<8x1xf32>
    %102 = vector.extract_strided_slice %14 {offsets = [7, 0], sizes = [1, 32], strides = [1, 1]} : vector<32x32xf32> to vector<1x32xf32>
    %103 = vector.broadcast %101 : vector<8x1xf32> to vector<8x32xf32>
    %104 = vector.broadcast %102 : vector<1x32xf32> to vector<8x32xf32>
    %105 = arith.mulf %103, %104 : vector<8x32xf32>
    %106 = arith.addf %94, %105 : vector<8x32xf32>
    %107 = vector.extract_strided_slice %9 {offsets = [7, 0], sizes = [1, 32], strides = [1, 1]} : vector<32x32xf32> to vector<1x32xf32>
    %108 = vector.broadcast %101 : vector<8x1xf32> to vector<8x32xf32>
    %109 = vector.broadcast %107 : vector<1x32xf32> to vector<8x32xf32>
    %110 = arith.mulf %108, %109 : vector<8x32xf32>
    %111 = arith.addf %99, %110 : vector<8x32xf32>
    %112 = vector.extract_strided_slice %111 {offsets = [0, 8], sizes = [8, 1], strides = [1, 1]} : vector<8x32xf32> to vector<8x1xf32>
    %113 = math.tanh %112 : vector<8x1xf32>
    %114 = vector.extract_strided_slice %14 {offsets = [8, 0], sizes = [1, 32], strides = [1, 1]} : vector<32x32xf32> to vector<1x32xf32>
    %115 = vector.broadcast %113 : vector<8x1xf32> to vector<8x32xf32>
    %116 = vector.broadcast %114 : vector<1x32xf32> to vector<8x32xf32>
    %117 = arith.mulf %115, %116 : vector<8x32xf32>
    %118 = arith.addf %106, %117 : vector<8x32xf32>
    %119 = vector.extract_strided_slice %9 {offsets = [8, 0], sizes = [1, 32], strides = [1, 1]} : vector<32x32xf32> to vector<1x32xf32>
    %120 = vector.broadcast %113 : vector<8x1xf32> to vector<8x32xf32>
    %121 = vector.broadcast %119 : vector<1x32xf32> to vector<8x32xf32>
    %122 = arith.mulf %120, %121 : vector<8x32xf32>
    %123 = arith.addf %111, %122 : vector<8x32xf32>
    %124 = vector.extract_strided_slice %123 {offsets = [0, 9], sizes = [8, 1], strides = [1, 1]} : vector<8x32xf32> to vector<8x1xf32>
    %125 = math.tanh %124 : vector<8x1xf32>
    %126 = vector.extract_strided_slice %14 {offsets = [9, 0], sizes = [1, 32], strides = [1, 1]} : vector<32x32xf32> to vector<1x32xf32>
    %127 = vector.broadcast %125 : vector<8x1xf32> to vector<8x32xf32>
    %128 = vector.broadcast %126 : vector<1x32xf32> to vector<8x32xf32>
    %129 = arith.mulf %127, %128 : vector<8x32xf32>
    %130 = arith.addf %118, %129 : vector<8x32xf32>
    %131 = vector.extract_strided_slice %9 {offsets = [9, 0], sizes = [1, 32], strides = [1, 1]} : vector<32x32xf32> to vector<1x32xf32>
    %132 = vector.broadcast %125 : vector<8x1xf32> to vector<8x32xf32>
    %133 = vector.broadcast %131 : vector<1x32xf32> to vector<8x32xf32>
    %134 = arith.mulf %132, %133 : vector<8x32xf32>
    %135 = arith.addf %123, %134 : vector<8x32xf32>
    %136 = vector.extract_strided_slice %135 {offsets = [0, 10], sizes = [8, 1], strides = [1, 1]} : vector<8x32xf32> to vector<8x1xf32>
    %137 = math.tanh %136 : vector<8x1xf32>
    %138 = vector.extract_strided_slice %14 {offsets = [10, 0], sizes = [1, 32], strides = [1, 1]} : vector<32x32xf32> to vector<1x32xf32>
    %139 = vector.broadcast %137 : vector<8x1xf32> to vector<8x32xf32>
    %140 = vector.broadcast %138 : vector<1x32xf32> to vector<8x32xf32>
    %141 = arith.mulf %139, %140 : vector<8x32xf32>
    %142 = arith.addf %130, %141 : vector<8x32xf32>
    %143 = vector.extract_strided_slice %9 {offsets = [10, 0], sizes = [1, 32], strides = [1, 1]} : vector<32x32xf32> to vector<1x32xf32>
    %144 = vector.broadcast %137 : vector<8x1xf32> to vector<8x32xf32>
    %145 = vector.broadcast %143 : vector<1x32xf32> to vector<8x32xf32>
    %146 = arith.mulf %144, %145 : vector<8x32xf32>
    %147 = arith.addf %135, %146 : vector<8x32xf32>
    %148 = vector.extract_strided_slice %147 {offsets = [0, 11], sizes = [8, 1], strides = [1, 1]} : vector<8x32xf32> to vector<8x1xf32>
    %149 = math.tanh %148 : vector<8x1xf32>
    %150 = vector.extract_strided_slice %14 {offsets = [11, 0], sizes = [1, 32], strides = [1, 1]} : vector<32x32xf32> to vector<1x32xf32>
    %151 = vector.broadcast %149 : vector<8x1xf32> to vector<8x32xf32>
    %152 = vector.broadcast %150 : vector<1x32xf32> to vector<8x32xf32>
    %153 = arith.mulf %151, %152 : vector<8x32xf32>
    %154 = arith.addf %142, %153 : vector<8x32xf32>
    %155 = vector.extract_strided_slice %9 {offsets = [11, 0], sizes = [1, 32], strides = [1, 1]} : vector<32x32xf32> to vector<1x32xf32>
    %156 = vector.broadcast %149 : vector<8x1xf32> to vector<8x32xf32>
    %157 = vector.broadcast %155 : vector<1x32xf32> to vector<8x32xf32>
    %158 = arith.mulf %156, %157 : vector<8x32xf32>
    %159 = arith.addf %147, %158 : vector<8x32xf32>
    %160 = vector.extract_strided_slice %159 {offsets = [0, 12], sizes = [8, 1], strides = [1, 1]} : vector<8x32xf32> to vector<8x1xf32>
    %161 = math.tanh %160 : vector<8x1xf32>
    %162 = vector.extract_strided_slice %14 {offsets = [12, 0], sizes = [1, 32], strides = [1, 1]} : vector<32x32xf32> to vector<1x32xf32>
    %163 = vector.broadcast %161 : vector<8x1xf32> to vector<8x32xf32>
    %164 = vector.broadcast %162 : vector<1x32xf32> to vector<8x32xf32>
    %165 = arith.mulf %163, %164 : vector<8x32xf32>
    %166 = arith.addf %154, %165 : vector<8x32xf32>
    %167 = vector.extract_strided_slice %9 {offsets = [12, 0], sizes = [1, 32], strides = [1, 1]} : vector<32x32xf32> to vector<1x32xf32>
    %168 = vector.broadcast %161 : vector<8x1xf32> to vector<8x32xf32>
    %169 = vector.broadcast %167 : vector<1x32xf32> to vector<8x32xf32>
    %170 = arith.mulf %168, %169 : vector<8x32xf32>
    %171 = arith.addf %159, %170 : vector<8x32xf32>
    %172 = vector.extract_strided_slice %171 {offsets = [0, 13], sizes = [8, 1], strides = [1, 1]} : vector<8x32xf32> to vector<8x1xf32>
    %173 = math.tanh %172 : vector<8x1xf32>
    %174 = vector.extract_strided_slice %14 {offsets = [13, 0], sizes = [1, 32], strides = [1, 1]} : vector<32x32xf32> to vector<1x32xf32>
    %175 = vector.broadcast %173 : vector<8x1xf32> to vector<8x32xf32>
    %176 = vector.broadcast %174 : vector<1x32xf32> to vector<8x32xf32>
    %177 = arith.mulf %175, %176 : vector<8x32xf32>
    %178 = arith.addf %166, %177 : vector<8x32xf32>
    %179 = vector.extract_strided_slice %9 {offsets = [13, 0], sizes = [1, 32], strides = [1, 1]} : vector<32x32xf32> to vector<1x32xf32>
    %180 = vector.broadcast %173 : vector<8x1xf32> to vector<8x32xf32>
    %181 = vector.broadcast %179 : vector<1x32xf32> to vector<8x32xf32>
    %182 = arith.mulf %180, %181 : vector<8x32xf32>
    %183 = arith.addf %171, %182 : vector<8x32xf32>
    %184 = vector.extract_strided_slice %183 {offsets = [0, 14], sizes = [8, 1], strides = [1, 1]} : vector<8x32xf32> to vector<8x1xf32>
    %185 = math.tanh %184 : vector<8x1xf32>
    %186 = vector.extract_strided_slice %14 {offsets = [14, 0], sizes = [1, 32], strides = [1, 1]} : vector<32x32xf32> to vector<1x32xf32>
    %187 = vector.broadcast %185 : vector<8x1xf32> to vector<8x32xf32>
    %188 = vector.broadcast %186 : vector<1x32xf32> to vector<8x32xf32>
    %189 = arith.mulf %187, %188 : vector<8x32xf32>
    %190 = arith.addf %178, %189 : vector<8x32xf32>
    %191 = vector.extract_strided_slice %9 {offsets = [14, 0], sizes = [1, 32], strides = [1, 1]} : vector<32x32xf32> to vector<1x32xf32>
    %192 = vector.broadcast %185 : vector<8x1xf32> to vector<8x32xf32>
    %193 = vector.broadcast %191 : vector<1x32xf32> to vector<8x32xf32>
    %194 = arith.mulf %192, %193 : vector<8x32xf32>
    %195 = arith.addf %183, %194 : vector<8x32xf32>
    %196 = vector.extract_strided_slice %195 {offsets = [0, 15], sizes = [8, 1], strides = [1, 1]} : vector<8x32xf32> to vector<8x1xf32>
    %197 = math.tanh %196 : vector<8x1xf32>
    %198 = vector.extract_strided_slice %14 {offsets = [15, 0], sizes = [1, 32], strides = [1, 1]} : vector<32x32xf32> to vector<1x32xf32>
    %199 = vector.broadcast %197 : vector<8x1xf32> to vector<8x32xf32>
    %200 = vector.broadcast %198 : vector<1x32xf32> to vector<8x32xf32>
    %201 = arith.mulf %199, %200 : vector<8x32xf32>
    %202 = arith.addf %190, %201 : vector<8x32xf32>
    %203 = vector.extract_strided_slice %9 {offsets = [15, 0], sizes = [1, 32], strides = [1, 1]} : vector<32x32xf32> to vector<1x32xf32>
    %204 = vector.broadcast %197 : vector<8x1xf32> to vector<8x32xf32>
    %205 = vector.broadcast %203 : vector<1x32xf32> to vector<8x32xf32>
    %206 = arith.mulf %204, %205 : vector<8x32xf32>
    %207 = arith.addf %195, %206 : vector<8x32xf32>
    %208 = vector.extract_strided_slice %207 {offsets = [0, 16], sizes = [8, 1], strides = [1, 1]} : vector<8x32xf32> to vector<8x1xf32>
    %209 = math.tanh %208 : vector<8x1xf32>
    %210 = vector.extract_strided_slice %14 {offsets = [16, 0], sizes = [1, 32], strides = [1, 1]} : vector<32x32xf32> to vector<1x32xf32>
    %211 = vector.broadcast %209 : vector<8x1xf32> to vector<8x32xf32>
    %212 = vector.broadcast %210 : vector<1x32xf32> to vector<8x32xf32>
    %213 = arith.mulf %211, %212 : vector<8x32xf32>
    %214 = arith.addf %202, %213 : vector<8x32xf32>
    %215 = vector.extract_strided_slice %9 {offsets = [16, 0], sizes = [1, 32], strides = [1, 1]} : vector<32x32xf32> to vector<1x32xf32>
    %216 = vector.broadcast %209 : vector<8x1xf32> to vector<8x32xf32>
    %217 = vector.broadcast %215 : vector<1x32xf32> to vector<8x32xf32>
    %218 = arith.mulf %216, %217 : vector<8x32xf32>
    %219 = arith.addf %207, %218 : vector<8x32xf32>
    %220 = vector.extract_strided_slice %219 {offsets = [0, 17], sizes = [8, 1], strides = [1, 1]} : vector<8x32xf32> to vector<8x1xf32>
    %221 = math.tanh %220 : vector<8x1xf32>
    %222 = vector.extract_strided_slice %14 {offsets = [17, 0], sizes = [1, 32], strides = [1, 1]} : vector<32x32xf32> to vector<1x32xf32>
    %223 = vector.broadcast %221 : vector<8x1xf32> to vector<8x32xf32>
    %224 = vector.broadcast %222 : vector<1x32xf32> to vector<8x32xf32>
    %225 = arith.mulf %223, %224 : vector<8x32xf32>
    %226 = arith.addf %214, %225 : vector<8x32xf32>
    %227 = vector.extract_strided_slice %9 {offsets = [17, 0], sizes = [1, 32], strides = [1, 1]} : vector<32x32xf32> to vector<1x32xf32>
    %228 = vector.broadcast %221 : vector<8x1xf32> to vector<8x32xf32>
    %229 = vector.broadcast %227 : vector<1x32xf32> to vector<8x32xf32>
    %230 = arith.mulf %228, %229 : vector<8x32xf32>
    %231 = arith.addf %219, %230 : vector<8x32xf32>
    %232 = vector.extract_strided_slice %231 {offsets = [0, 18], sizes = [8, 1], strides = [1, 1]} : vector<8x32xf32> to vector<8x1xf32>
    %233 = math.tanh %232 : vector<8x1xf32>
    %234 = vector.extract_strided_slice %14 {offsets = [18, 0], sizes = [1, 32], strides = [1, 1]} : vector<32x32xf32> to vector<1x32xf32>
    %235 = vector.broadcast %233 : vector<8x1xf32> to vector<8x32xf32>
    %236 = vector.broadcast %234 : vector<1x32xf32> to vector<8x32xf32>
    %237 = arith.mulf %235, %236 : vector<8x32xf32>
    %238 = arith.addf %226, %237 : vector<8x32xf32>
    %239 = vector.extract_strided_slice %9 {offsets = [18, 0], sizes = [1, 32], strides = [1, 1]} : vector<32x32xf32> to vector<1x32xf32>
    %240 = vector.broadcast %233 : vector<8x1xf32> to vector<8x32xf32>
    %241 = vector.broadcast %239 : vector<1x32xf32> to vector<8x32xf32>
    %242 = arith.mulf %240, %241 : vector<8x32xf32>
    %243 = arith.addf %231, %242 : vector<8x32xf32>
    %244 = vector.extract_strided_slice %243 {offsets = [0, 19], sizes = [8, 1], strides = [1, 1]} : vector<8x32xf32> to vector<8x1xf32>
    %245 = math.tanh %244 : vector<8x1xf32>
    %246 = vector.extract_strided_slice %14 {offsets = [19, 0], sizes = [1, 32], strides = [1, 1]} : vector<32x32xf32> to vector<1x32xf32>
    %247 = vector.broadcast %245 : vector<8x1xf32> to vector<8x32xf32>
    %248 = vector.broadcast %246 : vector<1x32xf32> to vector<8x32xf32>
    %249 = arith.mulf %247, %248 : vector<8x32xf32>
    %250 = arith.addf %238, %249 : vector<8x32xf32>
    %251 = vector.extract_strided_slice %9 {offsets = [19, 0], sizes = [1, 32], strides = [1, 1]} : vector<32x32xf32> to vector<1x32xf32>
    %252 = vector.broadcast %245 : vector<8x1xf32> to vector<8x32xf32>
    %253 = vector.broadcast %251 : vector<1x32xf32> to vector<8x32xf32>
    %254 = arith.mulf %252, %253 : vector<8x32xf32>
    %255 = arith.addf %243, %254 : vector<8x32xf32>
    %256 = vector.extract_strided_slice %255 {offsets = [0, 20], sizes = [8, 1], strides = [1, 1]} : vector<8x32xf32> to vector<8x1xf32>
    %257 = math.tanh %256 : vector<8x1xf32>
    %258 = vector.extract_strided_slice %14 {offsets = [20, 0], sizes = [1, 32], strides = [1, 1]} : vector<32x32xf32> to vector<1x32xf32>
    %259 = vector.broadcast %257 : vector<8x1xf32> to vector<8x32xf32>
    %260 = vector.broadcast %258 : vector<1x32xf32> to vector<8x32xf32>
    %261 = arith.mulf %259, %260 : vector<8x32xf32>
    %262 = arith.addf %250, %261 : vector<8x32xf32>
    %263 = vector.extract_strided_slice %9 {offsets = [20, 0], sizes = [1, 32], strides = [1, 1]} : vector<32x32xf32> to vector<1x32xf32>
    %264 = vector.broadcast %257 : vector<8x1xf32> to vector<8x32xf32>
    %265 = vector.broadcast %263 : vector<1x32xf32> to vector<8x32xf32>
    %266 = arith.mulf %264, %265 : vector<8x32xf32>
    %267 = arith.addf %255, %266 : vector<8x32xf32>
    %268 = vector.extract_strided_slice %267 {offsets = [0, 21], sizes = [8, 1], strides = [1, 1]} : vector<8x32xf32> to vector<8x1xf32>
    %269 = math.tanh %268 : vector<8x1xf32>
    %270 = vector.extract_strided_slice %14 {offsets = [21, 0], sizes = [1, 32], strides = [1, 1]} : vector<32x32xf32> to vector<1x32xf32>
    %271 = vector.broadcast %269 : vector<8x1xf32> to vector<8x32xf32>
    %272 = vector.broadcast %270 : vector<1x32xf32> to vector<8x32xf32>
    %273 = arith.mulf %271, %272 : vector<8x32xf32>
    %274 = arith.addf %262, %273 : vector<8x32xf32>
    %275 = vector.extract_strided_slice %9 {offsets = [21, 0], sizes = [1, 32], strides = [1, 1]} : vector<32x32xf32> to vector<1x32xf32>
    %276 = vector.broadcast %269 : vector<8x1xf32> to vector<8x32xf32>
    %277 = vector.broadcast %275 : vector<1x32xf32> to vector<8x32xf32>
    %278 = arith.mulf %276, %277 : vector<8x32xf32>
    %279 = arith.addf %267, %278 : vector<8x32xf32>
    %280 = vector.extract_strided_slice %279 {offsets = [0, 22], sizes = [8, 1], strides = [1, 1]} : vector<8x32xf32> to vector<8x1xf32>
    %281 = math.tanh %280 : vector<8x1xf32>
    %282 = vector.extract_strided_slice %14 {offsets = [22, 0], sizes = [1, 32], strides = [1, 1]} : vector<32x32xf32> to vector<1x32xf32>
    %283 = vector.broadcast %281 : vector<8x1xf32> to vector<8x32xf32>
    %284 = vector.broadcast %282 : vector<1x32xf32> to vector<8x32xf32>
    %285 = arith.mulf %283, %284 : vector<8x32xf32>
    %286 = arith.addf %274, %285 : vector<8x32xf32>
    %287 = vector.extract_strided_slice %9 {offsets = [22, 0], sizes = [1, 32], strides = [1, 1]} : vector<32x32xf32> to vector<1x32xf32>
    %288 = vector.broadcast %281 : vector<8x1xf32> to vector<8x32xf32>
    %289 = vector.broadcast %287 : vector<1x32xf32> to vector<8x32xf32>
    %290 = arith.mulf %288, %289 : vector<8x32xf32>
    %291 = arith.addf %279, %290 : vector<8x32xf32>
    %292 = vector.extract_strided_slice %291 {offsets = [0, 23], sizes = [8, 1], strides = [1, 1]} : vector<8x32xf32> to vector<8x1xf32>
    %293 = math.tanh %292 : vector<8x1xf32>
    %294 = vector.extract_strided_slice %14 {offsets = [23, 0], sizes = [1, 32], strides = [1, 1]} : vector<32x32xf32> to vector<1x32xf32>
    %295 = vector.broadcast %293 : vector<8x1xf32> to vector<8x32xf32>
    %296 = vector.broadcast %294 : vector<1x32xf32> to vector<8x32xf32>
    %297 = arith.mulf %295, %296 : vector<8x32xf32>
    %298 = arith.addf %286, %297 : vector<8x32xf32>
    %299 = vector.extract_strided_slice %9 {offsets = [23, 0], sizes = [1, 32], strides = [1, 1]} : vector<32x32xf32> to vector<1x32xf32>
    %300 = vector.broadcast %293 : vector<8x1xf32> to vector<8x32xf32>
    %301 = vector.broadcast %299 : vector<1x32xf32> to vector<8x32xf32>
    %302 = arith.mulf %300, %301 : vector<8x32xf32>
    %303 = arith.addf %291, %302 : vector<8x32xf32>
    %304 = vector.extract_strided_slice %303 {offsets = [0, 24], sizes = [8, 1], strides = [1, 1]} : vector<8x32xf32> to vector<8x1xf32>
    %305 = math.tanh %304 : vector<8x1xf32>
    %306 = vector.extract_strided_slice %14 {offsets = [24, 0], sizes = [1, 32], strides = [1, 1]} : vector<32x32xf32> to vector<1x32xf32>
    %307 = vector.broadcast %305 : vector<8x1xf32> to vector<8x32xf32>
    %308 = vector.broadcast %306 : vector<1x32xf32> to vector<8x32xf32>
    %309 = arith.mulf %307, %308 : vector<8x32xf32>
    %310 = arith.addf %298, %309 : vector<8x32xf32>
    %311 = vector.extract_strided_slice %9 {offsets = [24, 0], sizes = [1, 32], strides = [1, 1]} : vector<32x32xf32> to vector<1x32xf32>
    %312 = vector.broadcast %305 : vector<8x1xf32> to vector<8x32xf32>
    %313 = vector.broadcast %311 : vector<1x32xf32> to vector<8x32xf32>
    %314 = arith.mulf %312, %313 : vector<8x32xf32>
    %315 = arith.addf %303, %314 : vector<8x32xf32>
    %316 = vector.extract_strided_slice %315 {offsets = [0, 25], sizes = [8, 1], strides = [1, 1]} : vector<8x32xf32> to vector<8x1xf32>
    %317 = math.tanh %316 : vector<8x1xf32>
    %318 = vector.extract_strided_slice %14 {offsets = [25, 0], sizes = [1, 32], strides = [1, 1]} : vector<32x32xf32> to vector<1x32xf32>
    %319 = vector.broadcast %317 : vector<8x1xf32> to vector<8x32xf32>
    %320 = vector.broadcast %318 : vector<1x32xf32> to vector<8x32xf32>
    %321 = arith.mulf %319, %320 : vector<8x32xf32>
    %322 = arith.addf %310, %321 : vector<8x32xf32>
    %323 = vector.extract_strided_slice %9 {offsets = [25, 0], sizes = [1, 32], strides = [1, 1]} : vector<32x32xf32> to vector<1x32xf32>
    %324 = vector.broadcast %317 : vector<8x1xf32> to vector<8x32xf32>
    %325 = vector.broadcast %323 : vector<1x32xf32> to vector<8x32xf32>
    %326 = arith.mulf %324, %325 : vector<8x32xf32>
    %327 = arith.addf %315, %326 : vector<8x32xf32>
    %328 = vector.extract_strided_slice %327 {offsets = [0, 26], sizes = [8, 1], strides = [1, 1]} : vector<8x32xf32> to vector<8x1xf32>
    %329 = math.tanh %328 : vector<8x1xf32>
    %330 = vector.extract_strided_slice %14 {offsets = [26, 0], sizes = [1, 32], strides = [1, 1]} : vector<32x32xf32> to vector<1x32xf32>
    %331 = vector.broadcast %329 : vector<8x1xf32> to vector<8x32xf32>
    %332 = vector.broadcast %330 : vector<1x32xf32> to vector<8x32xf32>
    %333 = arith.mulf %331, %332 : vector<8x32xf32>
    %334 = arith.addf %322, %333 : vector<8x32xf32>
    %335 = vector.extract_strided_slice %9 {offsets = [26, 0], sizes = [1, 32], strides = [1, 1]} : vector<32x32xf32> to vector<1x32xf32>
    %336 = vector.broadcast %329 : vector<8x1xf32> to vector<8x32xf32>
    %337 = vector.broadcast %335 : vector<1x32xf32> to vector<8x32xf32>
    %338 = arith.mulf %336, %337 : vector<8x32xf32>
    %339 = arith.addf %327, %338 : vector<8x32xf32>
    %340 = vector.extract_strided_slice %339 {offsets = [0, 27], sizes = [8, 1], strides = [1, 1]} : vector<8x32xf32> to vector<8x1xf32>
    %341 = math.tanh %340 : vector<8x1xf32>
    %342 = vector.extract_strided_slice %14 {offsets = [27, 0], sizes = [1, 32], strides = [1, 1]} : vector<32x32xf32> to vector<1x32xf32>
    %343 = vector.broadcast %341 : vector<8x1xf32> to vector<8x32xf32>
    %344 = vector.broadcast %342 : vector<1x32xf32> to vector<8x32xf32>
    %345 = arith.mulf %343, %344 : vector<8x32xf32>
    %346 = arith.addf %334, %345 : vector<8x32xf32>
    %347 = vector.extract_strided_slice %9 {offsets = [27, 0], sizes = [1, 32], strides = [1, 1]} : vector<32x32xf32> to vector<1x32xf32>
    %348 = vector.broadcast %341 : vector<8x1xf32> to vector<8x32xf32>
    %349 = vector.broadcast %347 : vector<1x32xf32> to vector<8x32xf32>
    %350 = arith.mulf %348, %349 : vector<8x32xf32>
    %351 = arith.addf %339, %350 : vector<8x32xf32>
    %352 = vector.extract_strided_slice %351 {offsets = [0, 28], sizes = [8, 1], strides = [1, 1]} : vector<8x32xf32> to vector<8x1xf32>
    %353 = math.tanh %352 : vector<8x1xf32>
    %354 = vector.extract_strided_slice %14 {offsets = [28, 0], sizes = [1, 32], strides = [1, 1]} : vector<32x32xf32> to vector<1x32xf32>
    %355 = vector.broadcast %353 : vector<8x1xf32> to vector<8x32xf32>
    %356 = vector.broadcast %354 : vector<1x32xf32> to vector<8x32xf32>
    %357 = arith.mulf %355, %356 : vector<8x32xf32>
    %358 = arith.addf %346, %357 : vector<8x32xf32>
    %359 = vector.extract_strided_slice %9 {offsets = [28, 0], sizes = [1, 32], strides = [1, 1]} : vector<32x32xf32> to vector<1x32xf32>
    %360 = vector.broadcast %353 : vector<8x1xf32> to vector<8x32xf32>
    %361 = vector.broadcast %359 : vector<1x32xf32> to vector<8x32xf32>
    %362 = arith.mulf %360, %361 : vector<8x32xf32>
    %363 = arith.addf %351, %362 : vector<8x32xf32>
    %364 = vector.extract_strided_slice %363 {offsets = [0, 29], sizes = [8, 1], strides = [1, 1]} : vector<8x32xf32> to vector<8x1xf32>
    %365 = math.tanh %364 : vector<8x1xf32>
    %366 = vector.extract_strided_slice %14 {offsets = [29, 0], sizes = [1, 32], strides = [1, 1]} : vector<32x32xf32> to vector<1x32xf32>
    %367 = vector.broadcast %365 : vector<8x1xf32> to vector<8x32xf32>
    %368 = vector.broadcast %366 : vector<1x32xf32> to vector<8x32xf32>
    %369 = arith.mulf %367, %368 : vector<8x32xf32>
    %370 = arith.addf %358, %369 : vector<8x32xf32>
    %371 = vector.extract_strided_slice %9 {offsets = [29, 0], sizes = [1, 32], strides = [1, 1]} : vector<32x32xf32> to vector<1x32xf32>
    %372 = vector.broadcast %365 : vector<8x1xf32> to vector<8x32xf32>
    %373 = vector.broadcast %371 : vector<1x32xf32> to vector<8x32xf32>
    %374 = arith.mulf %372, %373 : vector<8x32xf32>
    %375 = arith.addf %363, %374 : vector<8x32xf32>
    %376 = vector.extract_strided_slice %375 {offsets = [0, 30], sizes = [8, 1], strides = [1, 1]} : vector<8x32xf32> to vector<8x1xf32>
    %377 = math.tanh %376 : vector<8x1xf32>
    %378 = vector.extract_strided_slice %14 {offsets = [30, 0], sizes = [1, 32], strides = [1, 1]} : vector<32x32xf32> to vector<1x32xf32>
    %379 = vector.broadcast %377 : vector<8x1xf32> to vector<8x32xf32>
    %380 = vector.broadcast %378 : vector<1x32xf32> to vector<8x32xf32>
    %381 = arith.mulf %379, %380 : vector<8x32xf32>
    %382 = arith.addf %370, %381 : vector<8x32xf32>
    %383 = vector.extract_strided_slice %9 {offsets = [30, 0], sizes = [1, 32], strides = [1, 1]} : vector<32x32xf32> to vector<1x32xf32>
    %384 = vector.broadcast %377 : vector<8x1xf32> to vector<8x32xf32>
    %385 = vector.broadcast %383 : vector<1x32xf32> to vector<8x32xf32>
    %386 = arith.mulf %384, %385 : vector<8x32xf32>
    %387 = arith.addf %375, %386 : vector<8x32xf32>
    %388 = vector.extract_strided_slice %387 {offsets = [0, 31], sizes = [8, 1], strides = [1, 1]} : vector<8x32xf32> to vector<8x1xf32>
    %389 = math.tanh %388 : vector<8x1xf32>
    %390 = vector.extract_strided_slice %14 {offsets = [31, 0], sizes = [1, 32], strides = [1, 1]} : vector<32x32xf32> to vector<1x32xf32>
    %391 = vector.broadcast %389 : vector<8x1xf32> to vector<8x32xf32>
    %392 = vector.broadcast %390 : vector<1x32xf32> to vector<8x32xf32>
    %393 = arith.mulf %391, %392 : vector<8x32xf32>
    %394 = arith.addf %382, %393 : vector<8x32xf32>
    %395 = tpu.concatenate %1, %394, %5 in 1 : vector<8x32xf32>, vector<8x32xf32>, vector<8x4xf32> -> vector<8x68xf32>
    %c0_13 = arith.constant 0 : index
    %c0_14 = arith.constant 0 : index
    %396 = vector.load %arg6[%c0_13, %c0_14] : memref<68x34xf32, #tpu.memory_space<vmem>>, vector<68x34xf32>
    %cst_15 = arith.constant dense<0.000000e+00> : vector<8x34xf32>
    %397 = tpu.matmul %395, %396, %cst_15 {dimension_numbers = #tpu.dot_dimension_numbers<[1], [0], [0], [1], [0, 0, 1, 1], [], []>, precision = #tpu.contract_precision<fp32>} : vector<8x68xf32>, vector<68x34xf32>, vector<8x34xf32> -> vector<8x34xf32>
    %398 = vector.extract_strided_slice %397 {offsets = [0, 0], sizes = [8, 32], strides = [1, 1]} : vector<8x34xf32> to vector<8x32xf32>
    %c0_16 = arith.constant 0 : index
    %c0_17 = arith.constant 0 : index
    %399 = vector.load %arg7[%c0_16, %c0_17] : memref<32x32xf32, #tpu.memory_space<vmem>>, vector<32x32xf32>
    %cst_18 = arith.constant dense<0.000000e+00> : vector<8x32xf32>
    %400 = tpu.matmul %398, %399, %cst_18 {dimension_numbers = #tpu.dot_dimension_numbers<[1], [0], [0], [1], [0, 0, 1, 1], [], []>, precision = #tpu.contract_precision<fp32>} : vector<8x32xf32>, vector<32x32xf32>, vector<8x32xf32> -> vector<8x32xf32>
    %401 = vector.extract_strided_slice %397 {offsets = [0, 32], sizes = [8, 2], strides = [1, 1]} : vector<8x34xf32> to vector<8x2xf32>
    %cst_19 = arith.constant 0.000000e+00 : f32
    %402 = vector.broadcast %cst_19 : f32 to vector<8x94xf32>
    %403 = tpu.concatenate %400, %401, %402 in 1 : vector<8x32xf32>, vector<8x2xf32>, vector<8x94xf32> -> vector<8x128xf32>
    %c0_20 = arith.constant 0 : index
    %c0_21 = arith.constant 0 : index
    %404 = vector.load %arg8[%c0_20, %c0_21] : memref<8x128xf32, #tpu.memory_space<vmem>>, vector<8x128xf32>
    tpu.vector_store %arg8[%c0_20, %c0_21], %403 {strides = array<i32>} : memref<8x128xf32, #tpu.memory_space<vmem>>, vector<8x128xf32>,
    return
  }
}

</mosaic_0001>

<bundles_post_ra>
// kernel: _lambda_.1
= control target key start
LH: loop header
LB: loop body
LE: loop exit
PB: predicated region body
PF: predicated region fallthrough
CT: control target
= control target key end

     0   :  { %13 = vsyncpa [#allocation3], 0  ;;  %s4212_s0 = inlined_call_operand.vmem [shape: f32[8,4], index: 0, kind: input, shape index: {}]   ;;  %s4213_s1 = inlined_call_operand.vmem [shape: f32[8,6], index: 1, kind: input, shape index: {}]   ;;  %s4214_s2 = inlined_call_operand.vmem [shape: f32[8,32], index: 2, kind: input, shape index: {}]   ;;  %s4215_s3 = inlined_call_operand.vmem [shape: f32[6,4], index: 3, kind: input, shape index: {}]   ;;  %s4216_s4 = inlined_call_operand.vmem [shape: f32[36,32], index: 4, kind: input, shape index: {}]   ;;  %s4217_s5 = inlined_call_operand.hbm [shape: f32[32,32], index: 5, kind: input, shape index: {}]   ;;  %s4218_s6 = inlined_call_operand.hbm [shape: f32[68,34], index: 6, kind: input, shape index: {}]   ;;  %s4219_s7 = inlined_call_operand.hbm [shape: f32[32,32], index: 7, kind: input, shape index: {}]   ;;  %s4220_s8 = inlined_call_operand.vmem [shape: f32[8,128], index: 8, kind: output, shape index: {}]  }
   0x1   :  { %14 = vsyncpa [#allocation5], 0  ;;  %s3361_s27 = smov [#allocation4]   ;;  %s3362_s29 = smov [#allocation2]  }
   0x2   :  { %s42_s28 = sshll.u32 %s3361_s27, 4  ;;  %s30_s30 = sshll.u32 %s3362_s29, 4  ;;  %s43_s28 = int_to_ptr.vmem [resolvable:$true] %s42_s28  ;;  %s31_s30 = int_to_ptr.vmem [resolvable:$true] %s30_s30 }
   0x3   :  { %s3305_s9 = scalar_lea.vmem %s43_s28, 1152  ;;  %p3310_p1 = scmp.lt.s32.totalorder %s43_s28, %s43_s28 }
   0x4   :  { %p3306_p0 = scmp.ne.s32.totalorder %s43_s28, %s3305_s9  ;;  %p3311_p2 = scmp.lt.s32.totalorder %s3305_s9, %s3305_s9 }
   0x6   :  { %p3312_p3 = por %p3311_p2, %p3310_p1 }
   0x8   :  { %p3313_p4 = pnand %p3312_p3, %p3306_p0 }
   0xa   :  { %3316 = shalt.err (!%p3313_p4)
}
   0xb   :  { %s3363_s10 = smov 128   ;;  %s3364_s11 = smov 8  }
   0xc   :  { %48 = dma.hbm_to_vmem [thread:$0]  %s4218_s6, 1152, %s43_s28, [#allocation5], %s3363_s10, %s3363_s10, %s3364_s11  }
   0xd   :  { %s3325_s14 = scalar_lea.vmem %s31_s30, 512  ;;  %p3330_p6 = scmp.lt.s32.totalorder %s31_s30, %s31_s30 }
   0xe   :  { %p3326_p5 = scmp.ne.s32.totalorder %s31_s30, %s3325_s14  ;;  %p3331_p7 = scmp.lt.s32.totalorder %s3325_s14, %s3325_s14 }
  0x10   :  { %p3332_p8 = por %p3331_p7, %p3330_p6 }
  0x12   :  { %p3333_p9 = pnand %p3332_p8, %p3326_p5 }
  0x14   :  { %3336 = shalt.err (!%p3333_p9)
}
  0x15   :  { %36 = dma.hbm_to_vmem [thread:$0]  %s4217_s5, 512, %s31_s30, [#allocation3], %s3363_s10, %s3363_s10, %s3364_s11  }
  0x16   :  { %s3365_s17 = smov [#allocation6]  }
  0x17   :  { %s54_s18 = sshll.u32 %s3365_s17, 4  ;;  %s55_s18 = int_to_ptr.vmem [resolvable:$true] %s54_s18 }
  0x18   :  { %s3345_s19 = scalar_lea.vmem %s55_s18, 512  ;;  %p3350_p11 = scmp.lt.s32.totalorder %s55_s18, %s55_s18 }
  0x19   :  { %p3346_p10 = scmp.ne.s32.totalorder %s55_s18, %s3345_s19  ;;  %p3351_p12 = scmp.lt.s32.totalorder %s3345_s19, %s3345_s19 }
  0x1b   :  { %p3352_p13 = por %p3351_p12, %p3350_p11 }
  0x1d   :  { %p3353_p0 = pnand %p3352_p13, %p3346_p10 }
  0x1f   :  { %3356 = shalt.err (!%p3353_p0)
}
  0x20   :  { %60 = dma.hbm_to_vmem [thread:$0]  %s4219_s7, 512, %s55_s18, [#allocation5], %s3363_s10, %s3363_s10, %s3364_s11  }
  0x21   :  { %3357 = dma.done.wait [#allocation3], 512  }
  0x22   :  { %3358 = vsyncadd [#allocation3], 4294966784 }
  0x23   :  { %3359 = dma.done.wait [#allocation5], 1664  }
  0x24   :  { %3360 = vsyncadd [#allocation5], 4294965632  ;;  %v4226_v0 = vmov 0.0   ;;  %vm3367_vm0 = vmmov 0   ;;  %vm78_vm1 = vcmask 1045504   ;;  %vm74_vm2 = vcmask 48128  }
  0x25   :  { %2859 = vmatprep.subr.mxu0 %v4226_v0  ;;  %2861 = vmatprep.mubr.msk.f32.mxu0 %vm3367_vm0, %v4226_v0  ;;  %v73_v1 = vld [vmem:[%s4215_s3] sm:$0x3f]  ;;  %vm544_vm3 = vcmask 1043456   ;;  %v538_v16 = vld [vmem:[%s4216_s4 + $0x18] sm:$0xff]  ;;  %v537_v17 = vld [vmem:[%s4216_s4 + $0x10] sm:$0xff]  ;;  %s3368_s10 = smov 32  }
  0x26   :  { %2864 = vmatprep.subr.mxu1 %v4226_v0  ;;  %2866 = vmatprep.mubr.msk.f32.mxu1 %vm3367_vm0, %v4226_v0  ;;  %v72_v2 = vld [vmem:[%s4213_s1] sm:$0xff]  ;;  %v80_v3 = vsel %vm78_vm1, %v73_v1, 0  ;;  %v3496_v19 = vand.u32 4294901760, %v538_v16  ;;  %v3498_v20 = vand.u32 4294901760, %v537_v17  ;;  %v536_v34 = vld [vmem:[%s4216_s4 + $0x8] sm:$0xff]  ;;  %vm533_vm4 = vcmask 261120  }
  0x27   :  { %v76_v4 = vsel %vm74_vm2, %v72_v2, 0  ;;  %v113_v5 = vand.u32 4294901760, %v80_v3  ;;  %v539_v15 = vld [vmem:[%s4216_s4 + $0x20] sm:$0xf]  ;;  %v3535_v35 = vand.u32 4294901760, %v536_v34  ;;  %vm540_vm5 = vcmask 293888  }
  0x28   :  { %v148_v6 = vand.u32 4294901760, %v76_v4  ;;  %v546_v18 = vsel %vm544_vm3, %v539_v15, 0  ;;  %v3503_v22 = vsub.f32 %v538_v16, %v3496_v19  ;;  %v3506_v23 = vsub.f32 %v537_v17, %v3498_v20  ;;  %v535_v36 = vld [vmem:[%s4216_s4] sm:$0xff] }
  0x29   :  { %2860 = vmatpush3.msra.mxu0 %v113_v5  ;;  %v190_v8 = vsub.f32 %v80_v3, %v113_v5  ;;  %v3500_v21 = vand.u32 4294901760, %v546_v18  ;;  %v3541_v37 = vsub.f32 %v536_v34, %v3535_v35  ;;  %v3543_v38 = vand.u32 4294901760, %v535_v36  ;;  %v70_v61 = vld [vmem:[%s4212_s0] sm:$0xff]  ;;  %s3401_s0 = smov 64  }
  0x2a   :  { %v149_v7 = vsub.f32 %v76_v4, %v148_v6  ;;  %2869 = vmatprep.subr.mxu0 %v4226_v0  ;;  %v660_v25 = vand.u32 4294901760, %v3503_v22  ;;  %v667_v26 = vand.u32 4294901760, %v3506_v23  ;;  %v71_v2 = vld [vmem:[%s4214_s2] sm:$0xff]  ;;  %vm1647_vm10 = vcmask 523264  }
  0x2b   :  { %v191_v10 = vand.u32 4294901760, %v190_v8  ;;  %v3509_v24 = vsub.f32 %v546_v18, %v3500_v21  ;;  %v674_v39 = vand.u32 4294901760, %v3541_v37  ;;  %v3549_v40 = vsub.f32 %v535_v36, %v3543_v38  ;;  %v3636_v34 = vld [vmem:[#allocation2] sm:$0xff] }
  0x2c   :  { %v150_v9 = vand.u32 4294901760, %v149_v7  ;;  %v661_v28 = vsub.f32 %v3503_v22, %v660_v25  ;;  %v668_v30 = vsub.f32 %v3506_v23, %v667_v26  ;;  %vm1658_vm11 = vcmask 556032  }
  0x2d   :  { %v192_v12 = vsub.f32 %v190_v8, %v191_v10  ;;  %v653_v27 = vand.u32 4294901760, %v3509_v24  ;;  %v675_v41 = vsub.f32 %v3541_v37, %v674_v39  ;;  %v681_v42 = vand.u32 4294901760, %v3549_v40 }
  0x2e   :  { %v151_v11 = vsub.f32 %v149_v7, %v150_v9  ;;  %v662_v32 = vand.u32 4294901760, %v661_v28  ;;  %v669_v33 = vand.u32 4294901760, %v668_v30  ;;  %v3370_v30 = vmov 1  }
  0x2f   :  { %v193_v14 = vand.u32 4294901760, %v192_v12  ;;  %v654_v29 = vsub.f32 %v3509_v24, %v653_v27  ;;  %v676_v44 = vand.u32 4294901760, %v675_v41  ;;  %v682_v45 = vsub.f32 %v3549_v40, %v681_v42  ;;  %3201 = vset.pattern.permute.xlu1 %v3370_v30 }
  0x30   :  { %v152_v13 = vand.u32 4294901760, %v151_v11  ;;  %v3369_v11 = vmov 0   ;;  %vm2708_vm12 = vcmask 277504  }
  0x31   :  { %2865 = vmatpush3.msra.mxu1 %v193_v14  ;;  %v655_v31 = vand.u32 4294901760, %v654_v29  ;;  %v683_v49 = vand.u32 4294901760, %v682_v45  ;;  %3200 = vset.pattern.permute.xlu0 %v3369_v11 }
  0x32   :  { %2862 = vmatmul.mubr.f32.vlgmr.msra.gmra.mxu0 %v152_v13  ;;  %2867 = vmatmul.mubr.f32.vlgmr.msra.gmra.mxu1 %v148_v6 }
  0x33   :  { %2870 = vmatpush3.msra.mxu0 %v190_v8  ;;  %2874 = vmatprep.subr.mxu1 %v4226_v0 }
  0x34   :  { %2871 = vmatprep.mubr.msk.f32.mxu0 %vm3367_vm0, %v4226_v0  ;;  %2875 = vmatpush3.msra.mxu1 %v113_v5 }
  0x35   :  { %2879 = vmatprep.subr.mxu0 %v4226_v0  ;;  %2876 = vmatprep.mubr.msk.f32.mxu1 %vm3367_vm0, %v4226_v0 }
  0x36   :  { %2872 = vmatmul.mubr.f32.vlgmr.msra.gmra.mxu0 %v149_v7  ;;  %2877 = vmatmul.mubr.f32.vlgmr.msra.gmra.mxu1 %v150_v9 }
  0x37   :  { %2880 = vmatpush3.msra.mxu0 %v191_v10  ;;  %2884 = vmatprep.subr.mxu1 %v4226_v0 }
  0x38   :  { %2881 = vmatprep.mubr.msk.f32.mxu0 %vm3367_vm0, %v4226_v0  ;;  %2885 = vmatpush3.msra.mxu1 %v113_v5 }
  0x39   :  { %2886 = vmatprep.mubr.msk.f32.mxu1 %vm3367_vm0, %v4226_v0  ;;  %2902 = vmatprep.subr.mxu1 %v4226_v0 }
  0x3a   :  { %2882 = vmatmul.mubr.f32.vlgmr.msra.gmra.mxu0 %v148_v6  ;;  %2887 = vmatmul.mubr.f32.vlgmr.msra.gmra.mxu1 %v148_v6 }
  0x3b   :  { %2889 = vmatprep.subr.mxu0 %v4226_v0  ;;  %2912 = vmatprep.mubr.msk.f32.mxu1 %vm3367_vm0, %v4226_v0 }
  0x3c   :  { %2899 = vmatprep.mubr.msk.f32.mxu0 %vm3367_vm0, %v4226_v0  ;;  %2890 = vmatpush3.msra.mxu0 %v3500_v21 }
  0x3d   :  { %2891 = vmatprep.subr.mxu0 %v4226_v0  ;;  %2903 = vmatpush3.msra.mxu1 %v655_v31  ;;  %v1050_v31 = vlaneseq }
  0x3e   :  { %2892 = vmatpush3.msra.mxu0 %v3496_v19  ;;  %2904 = vmatprep.subr.mxu1 %v4226_v0 }
  0x3f   :  { %2893 = vmatprep.subr.mxu0 %v4226_v0  ;;  %2905 = vmatpush3.msra.mxu1 %v662_v32  ;;  %v3631_v32 = vshrl.u32 %v1050_v31, 7 }
  0x40   :  { %2894 = vmatpush3.msra.mxu0 %v3498_v20  ;;  %2906 = vmatprep.subr.mxu1 %v4226_v0 }
  0x41   :  { %2895 = vmatprep.subr.mxu0 %v4226_v0  ;;  %2907 = vmatpush3.msra.mxu1 %v669_v33  ;;  %v3634_v33 = vsub.s32 0, %v3631_v32  ;;  %v3644_v41 = vsub.s32 1, %v3631_v32 }
  0x42   :  { %2908 = vmatprep.subr.mxu1 %v4226_v0  ;;  %2896 = vmatpush3.msra.mxu0 %v3535_v35 }
  0x43   :  { %2897 = vmatprep.subr.mxu0 %v4226_v0  ;;  %2909 = vmatpush3.msra.mxu1 %v676_v44 }
  0x44   :  { %2898 = vmatpush3.msra.mxu0 %v3543_v38  ;;  %2910 = vmatprep.subr.mxu1 %v4226_v0 }
  0x45   :  { %2915 = vmatprep.subr.mxu0 %v4226_v0  ;;  %2911 = vmatpush3.msra.mxu1 %v683_v49 }
  0x46   :  { %2928 = vmatprep.subr.mxu1 %v4226_v0 }
  0xf2   :  { %v154_v43 = vpop.f32.mrf.mxu0  ;;  %v230_v46 = vpop.f32.mrf.mxu1 }
  0xf3   :  { %v231_v47 = vadd.f32 %v230_v46, %v154_v43 }
  0xf4   :  { %v2863_v48 = vpop.f32.mrf.mxu0  ;;  %v2868_v50 = vpop.f32.mrf.mxu1 }
  0xf5   :  { %v3652_v48 = vsub.s32 2, %v3631_v32 }
  0xf6   :  { %v304_v51 = vpop.f32.mrf.mxu0  ;;  %v378_v53 = vpop.f32.mrf.mxu1 }
  0xf7   :  { %v305_v52 = vadd.f32 %v304_v51, %v231_v47  ;;  %v3372_v47 = vmov 3   ;;  %v1120_v49 = vrot.slane %v3636_v34, %v3652_v48 }
  0xf8   :  { %v2873_v54 = vpop.f32.mrf.mxu0  ;;  %v2878_v56 = vpop.f32.mrf.mxu1 }
  0xf9   :  { %v379_v55 = vadd.f32 %v378_v53, %v305_v52  ;;  %v3373_v54 = vmov 4  }
  0xfa   :  { %v452_v57 = vpop.f32.mrf.mxu0  ;;  %v524_v59 = vpop.f32.mrf.mxu1 }
  0xfb   :  { %v453_v58 = vadd.f32 %v452_v57, %v379_v55  ;;  %v3660_v55 = vsub.s32 3, %v3631_v32 }
  0xfc   :  { %v2883_v60 = vpop.f32.mrf.mxu0  ;;  %v2888_v63 = vpop.f32.mrf.mxu1 }
  0xfd   :  { %v525_v62 = vadd.f32 %v524_v59, %v453_v58  ;;  %v1138_v56 = vrot.slane %v3636_v34, %v3660_v55 }
  0xff   :  { %v3565_v1 = vsub.f32 %v70_v61, %v525_v62  ;;  %v3374_v61 = vmov 5   ;;  %v3668_v62 = vsub.s32 4, %v3631_v32 }
 0x101   :  { %530 = vrot.lane.b32.xlu0 %v3565_v1, %s3368_s10  ;;  %v1156_v63 = vrot.slane %v3636_v34, %v3668_v62 }
 0x173   :  { %v531_v3 = vpop.permute.xlu0 %530 }
 0x174   :  { %v534_v4 = vsel %vm533_vm4, %v71_v2, %v531_v3 }
 0x175   :  { %v542_v5 = vsel %vm540_vm5, %v534_v4, 0 }
 0x176   :  { %v618_v6 = vand.u32 4294901760, %v542_v5 }
 0x178   :  { %v619_v7 = vsub.f32 %v542_v5, %v618_v6  ;;  %2913 = vmatmul.mubr.f32.vlgmr.msra.gmra.mxu1 %v618_v6 }
 0x179   :  { %2929 = vmatpush3.msra.mxu1 %v3500_v21  ;;  %2938 = vmatprep.mubr.msk.f32.mxu1 %vm3367_vm0, %v4226_v0 }
 0x17a   :  { %v620_v8 = vand.u32 4294901760, %v619_v7  ;;  %2930 = vmatprep.subr.mxu1 %v4226_v0 }
 0x17b   :  { %2931 = vmatpush3.msra.mxu1 %v3496_v19 }
 0x17c   :  { %2932 = vmatprep.subr.mxu1 %v4226_v0  ;;  %v621_v9 = vsub.f32 %v619_v7, %v620_v8 }
 0x17d   :  { %2933 = vmatpush3.msra.mxu1 %v3498_v20 }
 0x17e   :  { %2934 = vmatprep.subr.mxu1 %v4226_v0  ;;  %v622_v10 = vand.u32 4294901760, %v621_v9 }
 0x17f   :  { %2935 = vmatpush3.msra.mxu1 %v3535_v35 }
 0x180   :  { %2936 = vmatprep.subr.mxu1 %v4226_v0  ;;  %2900 = vmatmul.mubr.f32.vlgmr.msra.gmra.mxu0 %v622_v10 }
 0x181   :  { %2916 = vmatpush3.msra.mxu0 %v3509_v24  ;;  %2937 = vmatpush3.msra.mxu1 %v3543_v38 }
 0x182   :  { %2917 = vmatprep.subr.mxu0 %v4226_v0  ;;  %2939 = vmatmul.mubr.f32.vlgmr.msra.gmra.mxu1 %v620_v8 }
 0x183   :  { %2954 = vmatprep.subr.mxu1 %v4226_v0  ;;  %2918 = vmatpush3.msra.mxu0 %v3503_v22 }
 0x184   :  { %2955 = vmatpush3.msra.mxu1 %v3500_v21  ;;  %2919 = vmatprep.subr.mxu0 %v4226_v0 }
 0x185   :  { %2956 = vmatprep.subr.mxu1 %v4226_v0  ;;  %2920 = vmatpush3.msra.mxu0 %v3506_v23 }
 0x186   :  { %2957 = vmatpush3.msra.mxu1 %v3496_v19  ;;  %2921 = vmatprep.subr.mxu0 %v4226_v0 }
 0x187   :  { %2958 = vmatprep.subr.mxu1 %v4226_v0  ;;  %2922 = vmatpush3.msra.mxu0 %v3541_v37 }
 0x188   :  { %2959 = vmatpush3.msra.mxu1 %v3498_v20  ;;  %2923 = vmatprep.subr.mxu0 %v4226_v0 }
 0x189   :  { %2960 = vmatprep.subr.mxu1 %v4226_v0  ;;  %2924 = vmatpush3.msra.mxu0 %v3549_v40  ;;  %v3371_v40 = vmov 2  }
 0x18a   :  { %2925 = vmatprep.mubr.msk.f32.mxu0 %vm3367_vm0, %v4226_v0  ;;  %2961 = vmatpush3.msra.mxu1 %v3535_v35  ;;  %v1084_v35 = vrot.slane %v3636_v34, %v3634_v33 }
 0x18b   :  { %2926 = vmatmul.mubr.f32.vlgmr.msra.gmra.mxu0 %v619_v7  ;;  %2941 = vmatprep.subr.mxu0 %v4226_v0  ;;  %v3676_v7 = vsub.s32 5, %v3631_v32 }
 0x18c   :  { %2962 = vmatprep.subr.mxu1 %v4226_v0  ;;  %2942 = vmatpush3.msra.mxu0 %v653_v27 }
 0x18d   :  { %2963 = vmatpush3.msra.mxu1 %v3543_v38  ;;  %2964 = vmatprep.mubr.msk.f32.mxu1 %vm3367_vm0, %v4226_v0  ;;  %v1174_v8 = vrot.slane %v3636_v34, %v3676_v7 }
 0x18e   :  { %2943 = vmatprep.subr.mxu0 %v4226_v0  ;;  %2965 = vmatmul.mubr.f32.vlgmr.msra.gmra.mxu1 %v618_v6 }
 0x18f   :  { %2944 = vmatpush3.msra.mxu0 %v660_v25  ;;  %2951 = vmatprep.mubr.msk.f32.mxu0 %vm3367_vm0, %v4226_v0 }
 0x190   :  { %2945 = vmatprep.subr.mxu0 %v4226_v0  ;;  %2988 = vmatprep.subr.mxu1 %v4226_v0 }
 0x191   :  { %2946 = vmatpush3.msra.mxu0 %v667_v26  ;;  %3006 = vmatprep.mubr.msk.f32.mxu1 %vm3367_vm0, %v4226_v0 }
 0x192   :  { %2947 = vmatprep.subr.mxu0 %v4226_v0 }
 0x193   :  { %2948 = vmatpush3.msra.mxu0 %v674_v39 }
 0x194   :  { %2949 = vmatprep.subr.mxu0 %v4226_v0 }
 0x195   :  { %2950 = vmatpush3.msra.mxu0 %v681_v42  ;;  %v1102_v42 = vrot.slane %v3636_v34, %v3644_v41 }
 0x196   :  { %2952 = vmatmul.mubr.f32.vlgmr.msra.gmra.mxu0 %v618_v6  ;;  %2967 = vmatprep.subr.mxu0 %v4226_v0  ;;  %v3375_v6 = vmov 6  }
 0x197   :  { %2985 = vmatprep.mubr.msk.f32.mxu0 %vm3367_vm0, %v4226_v0 }
 0x238   :  { %v720_v12 = vpop.f32.mrf.mxu1 }
 0x23a   :  { %v2914_v13 = vpop.f32.mrf.mxu1 }
 0x23b   :  { %v3376_v13 = vmov 7  }
 0x240   :  { %v624_v14 = vpop.f32.mrf.mxu0 }
 0x241   :  { %v721_v21 = vadd.f32 %v720_v12, %v624_v14  ;;  %v3684_v14 = vsub.s32 6, %v3631_v32 }
 0x242   :  { %v880_v15 = vpop.f32.mrf.mxu1  ;;  %v2901_v16 = vpop.f32.mrf.mxu0 }
 0x244   :  { %v2940_v17 = vpop.f32.mrf.mxu1 }
 0x24b   :  { %v802_v18 = vpop.f32.mrf.mxu0 }
 0x24c   :  { %v803_v23 = vadd.f32 %v802_v18, %v721_v21  ;;  %v3692_v21 = vsub.s32 7, %v3631_v32 }
 0x24d   :  { %v2927_v19 = vpop.f32.mrf.mxu0 }
 0x24e   :  { %v1042_v20 = vpop.f32.mrf.mxu1  ;;  %v881_v24 = vadd.f32 %v880_v15, %v803_v23  ;;  %v1192_v15 = vrot.slane %v3636_v34, %v3684_v14 }
 0x250   :  { %v2966_v22 = vpop.f32.mrf.mxu1 }
 0x251   :  { %v1210_v22 = vrot.slane %v3636_v34, %v3692_v21 }
 0x256   :  { %v966_v25 = vpop.f32.mrf.mxu0 }
 0x257   :  { %v967_v26 = vadd.f32 %v966_v25, %v881_v24 }
 0x258   :  { %v2953_v27 = vpop.f32.mrf.mxu0 }
 0x259   :  { %v1043_v28 = vadd.f32 %v1042_v20, %v967_v26  ;;  %v3377_v20 = vmov 8   ;;  %v3378_v27 = vmov 9  }
 0x25b   :  { %3232 = vtanh.f32 %v1043_v28 }
 0x268   :  { %v3233_v29 = vpop.eup %3232 }
 0x269   :  { %1072 = vperm.xlu0 %3200, %v3233_v29  }
 0x26d   :  { %3204 = vset.pattern.permute.xlu0 %v3373_v54  ;;  %v3381_v54 = vmov 12  }
 0x2e4   :  { %v3640_v36 = vpop.permute.xlu0 %1072 }
 0x2e5   :  { %v1085_v37 = vmul.f32 %v1084_v35, %v3640_v36 }
 0x2e7   :  { %v1086_v38 = vadd.f32 %v1085_v37, %v1043_v28  ;;  %v3699_v28 = vld [vmem:[#allocation2 + $0x8] sm:$0xff] }
 0x2e8   :  { %v1228_v29 = vrot.slane %v3699_v28, %v3634_v33 }
 0x2e9   :  { %3234 = vtanh.f32 %v1086_v38 }
 0x2f6   :  { %v3235_v39 = vpop.eup %3234 }
 0x2f7   :  { %1090 = vperm.xlu1 %3201, %v3235_v39   ;;  %v1246_v39 = vrot.slane %v3699_v28, %v3644_v41 }
 0x2fb   :  { %3202 = vset.pattern.permute.xlu1 %v3371_v40 }
 0x372   :  { %v3648_v43 = vpop.permute.xlu1 %1090 }
 0x373   :  { %v1103_v44 = vmul.f32 %v1102_v42, %v3648_v43 }
 0x375   :  { %v1104_v45 = vadd.f32 %v1103_v44, %v1086_v38  ;;  %v3379_v38 = vmov 10  }
 0x377   :  { %3236 = vtanh.f32 %v1104_v45 }
 0x384   :  { %v3237_v46 = vpop.eup %3236 }
 0x385   :  { %1108 = vperm.xlu1 %3202, %v3237_v46   ;;  %v3380_v46 = vmov 11  }
 0x389   :  { %3203 = vset.pattern.permute.xlu1 %v3372_v47  ;;  %v1264_v47 = vrot.slane %v3699_v28, %v3652_v48 }
 0x400   :  { %v3656_v50 = vpop.permute.xlu1 %1108 }
 0x401   :  { %v1121_v51 = vmul.f32 %v1120_v49, %v3656_v50 }
 0x403   :  { %v1122_v52 = vadd.f32 %v1121_v51, %v1104_v45 }
 0x405   :  { %3238 = vtanh.f32 %v1122_v52 }
 0x412   :  { %v3239_v53 = vpop.eup %3238 }
 0x413   :  { %1126 = vperm.xlu1 %3203, %v3239_v53  }
 0x417   :  { %3205 = vset.pattern.permute.xlu1 %v3374_v61 }
 0x48e   :  { %v3664_v57 = vpop.permute.xlu1 %1126 }
 0x48f   :  { %v1139_v58 = vmul.f32 %v1138_v56, %v3664_v57  ;;  %v1282_v56 = vrot.slane %v3699_v28, %v3660_v55 }
 0x491   :  { %v1140_v59 = vadd.f32 %v1139_v58, %v1122_v52 }
 0x493   :  { %3240 = vtanh.f32 %v1140_v59 }
 0x4a0   :  { %v3241_v60 = vpop.eup %3240 }
 0x4a1   :  { %1144 = vperm.xlu0 %3204, %v3241_v60  }
 0x4a5   :  { %3207 = vset.pattern.permute.xlu0 %v3376_v13 }
 0x51c   :  { %v3672_v2 = vpop.permute.xlu0 %1144 }
 0x51d   :  { %v1157_v3 = vmul.f32 %v1156_v63, %v3672_v2  ;;  %v3382_v63 = vmov 13  }
 0x51f   :  { %v1158_v4 = vadd.f32 %v1157_v3, %v1140_v59  ;;  %v1300_v3 = vrot.slane %v3699_v28, %v3668_v62 }
 0x521   :  { %3242 = vtanh.f32 %v1158_v4 }
 0x52e   :  { %v3243_v5 = vpop.eup %3242 }
 0x52f   :  { %1162 = vperm.xlu1 %3205, %v3243_v5  }
 0x533   :  { %3206 = vset.pattern.permute.xlu1 %v3375_v6 }
 0x5aa   :  { %v3680_v9 = vpop.permute.xlu1 %1162 }
 0x5ab   :  { %v1175_v10 = vmul.f32 %v1174_v8, %v3680_v9 }
 0x5ad   :  { %v1176_v11 = vadd.f32 %v1175_v10, %v1158_v4  ;;  %v3383_v10 = vmov 14  }
 0x5af   :  { %3244 = vtanh.f32 %v1176_v11 }
 0x5bc   :  { %v3245_v12 = vpop.eup %3244 }
 0x5bd   :  { %1180 = vperm.xlu1 %3206, %v3245_v12  }
 0x5c1   :  { %3208 = vset.pattern.permute.xlu1 %v3377_v20 }
 0x638   :  { %v3688_v16 = vpop.permute.xlu1 %1180 }
 0x639   :  { %v1193_v17 = vmul.f32 %v1192_v15, %v3688_v16 }
 0x63b   :  { %v1194_v18 = vadd.f32 %v1193_v17, %v1176_v11  ;;  %v1318_v11 = vrot.slane %v3699_v28, %v3676_v7 }
 0x63d   :  { %3246 = vtanh.f32 %v1194_v18 }
 0x64a   :  { %v3247_v19 = vpop.eup %3246 }
 0x64b   :  { %1198 = vperm.xlu0 %3207, %v3247_v19   ;;  %v1336_v19 = vrot.slane %v3699_v28, %v3684_v14 }
 0x64f   :  { %3210 = vset.pattern.permute.xlu0 %v3379_v38  ;;  %v3386_v38 = vmov 17  }
 0x6c6   :  { %v3696_v23 = vpop.permute.xlu0 %1198 }
 0x6c7   :  { %v1211_v24 = vmul.f32 %v1210_v22, %v3696_v23 }
 0x6c9   :  { %v1212_v25 = vadd.f32 %v1211_v24, %v1194_v18  ;;  %v3384_v18 = vmov 15  }
 0x6cb   :  { %3248 = vtanh.f32 %v1212_v25 }
 0x6d8   :  { %v3249_v26 = vpop.eup %3248 }
 0x6d9   :  { %1216 = vperm.xlu1 %3208, %v3249_v26   ;;  %v3385_v26 = vmov 16  }
 0x6dd   :  { %3209 = vset.pattern.permute.xlu1 %v3378_v27  ;;  %v1354_v27 = vrot.slane %v3699_v28, %v3692_v21 }
 0x754   :  { %v3703_v30 = vpop.permute.xlu1 %1216 }
 0x755   :  { %v1229_v35 = vmul.f32 %v1228_v29, %v3703_v30 }
 0x757   :  { %v1230_v34 = vadd.f32 %v1229_v35, %v1212_v25 }
 0x759   :  { %3250 = vtanh.f32 %v1230_v34 }
 0x766   :  { %v3251_v37 = vpop.eup %3250 }
 0x767   :  { %1234 = vperm.xlu1 %3209, %v3251_v37  }
 0x76b   :  { %3211 = vset.pattern.permute.xlu1 %v3380_v46 }
 0x7e2   :  { %v3708_v40 = vpop.permute.xlu1 %1234 }
 0x7e3   :  { %v1247_v42 = vmul.f32 %v1246_v39, %v3708_v40  ;;  %v3741_v39 = vld [vmem:[#allocation2 + $0x10] sm:$0xff] }
 0x7e5   :  { %v1248_v44 = vadd.f32 %v1247_v42, %v1230_v34  ;;  %v1372_v42 = vrot.slane %v3741_v39, %v3634_v33 }
 0x7e7   :  { %3252 = vtanh.f32 %v1248_v44 }
 0x7f4   :  { %v3253_v45 = vpop.eup %3252 }
 0x7f5   :  { %1252 = vperm.xlu0 %3210, %v3253_v45  }
 0x7f9   :  { %3213 = vset.pattern.permute.xlu0 %v3382_v63 }
 0x870   :  { %v3713_v49 = vpop.permute.xlu0 %1252 }
 0x871   :  { %v1265_v51 = vmul.f32 %v1264_v47, %v3713_v49  ;;  %v3387_v47 = vmov 18  }
 0x873   :  { %v1266_v52 = vadd.f32 %v1265_v51, %v1248_v44  ;;  %v1390_v51 = vrot.slane %v3741_v39, %v3644_v41 }
 0x875   :  { %3254 = vtanh.f32 %v1266_v52 }
 0x882   :  { %v3255_v53 = vpop.eup %3254 }
 0x883   :  { %1270 = vperm.xlu1 %3211, %v3255_v53  }
 0x887   :  { %3212 = vset.pattern.permute.xlu1 %v3381_v54 }
 0x8fe   :  { %v3718_v58 = vpop.permute.xlu1 %1270 }
 0x8ff   :  { %v1283_v59 = vmul.f32 %v1282_v56, %v3718_v58 }
 0x901   :  { %v1284_v60 = vadd.f32 %v1283_v59, %v1266_v52  ;;  %v3388_v59 = vmov 19  }
 0x903   :  { %3256 = vtanh.f32 %v1284_v60 }
 0x910   :  { %v3257_v61 = vpop.eup %3256 }
 0x911   :  { %1288 = vperm.xlu1 %3212, %v3257_v61  }
 0x915   :  { %3214 = vset.pattern.permute.xlu1 %v3383_v10 }
 0x98c   :  { %v3723_v4 = vpop.permute.xlu1 %1288 }
 0x98d   :  { %v1301_v5 = vmul.f32 %v1300_v3, %v3723_v4 }
 0x98f   :  { %v1302_v6 = vadd.f32 %v1301_v5, %v1284_v60  ;;  %v1408_v60 = vrot.slane %v3741_v39, %v3652_v48 }
 0x991   :  { %3258 = vtanh.f32 %v1302_v6 }
 0x99e   :  { %v3259_v8 = vpop.eup %3258 }
 0x99f   :  { %1306 = vperm.xlu0 %3213, %v3259_v8   ;;  %v1426_v8 = vrot.slane %v3741_v39, %v3660_v55 }
 0x9a3   :  { %3216 = vset.pattern.permute.xlu0 %v3385_v26  ;;  %v3391_v26 = vmov 22  }
 0xa1a   :  { %v3728_v12 = vpop.permute.xlu0 %1306 }
 0xa1b   :  { %v1319_v13 = vmul.f32 %v1318_v11, %v3728_v12 }
 0xa1d   :  { %v1320_v15 = vadd.f32 %v1319_v13, %v1302_v6  ;;  %v3389_v6 = vmov 20  }
 0xa1f   :  { %3260 = vtanh.f32 %v1320_v15 }
 0xa2c   :  { %v3261_v17 = vpop.eup %3260 }
 0xa2d   :  { %1324 = vperm.xlu1 %3214, %v3261_v17   ;;  %v3390_v17 = vmov 21  }
 0xa31   :  { %3215 = vset.pattern.permute.xlu1 %v3384_v18  ;;  %v1444_v18 = vrot.slane %v3741_v39, %v3668_v62 }
 0xaa8   :  { %v3733_v20 = vpop.permute.xlu1 %1324 }
 0xaa9   :  { %v1337_v22 = vmul.f32 %v1336_v19, %v3733_v20 }
 0xaab   :  { %v1338_v24 = vadd.f32 %v1337_v22, %v1320_v15 }
 0xaad   :  { %3262 = vtanh.f32 %v1338_v24 }
 0xaba   :  { %v3263_v25 = vpop.eup %3262 }
 0xabb   :  { %1342 = vperm.xlu1 %3215, %v3263_v25  }
 0xabf   :  { %3217 = vset.pattern.permute.xlu1 %v3386_v38 }
 0xb36   :  { %v3738_v29 = vpop.permute.xlu1 %1342 }
 0xb37   :  { %v1355_v35 = vmul.f32 %v1354_v27, %v3738_v29  ;;  %v1462_v27 = vrot.slane %v3741_v39, %v3676_v7 }
 0xb39   :  { %v1356_v34 = vadd.f32 %v1355_v35, %v1338_v24 }
 0xb3b   :  { %3264 = vtanh.f32 %v1356_v34 }
 0xb48   :  { %v3265_v37 = vpop.eup %3264 }
 0xb49   :  { %1360 = vperm.xlu0 %3216, %v3265_v37  }
 0xb4d   :  { %3219 = vset.pattern.permute.xlu0 %v3388_v59 }
 0xbc4   :  { %v3745_v44 = vpop.permute.xlu0 %1360 }
 0xbc5   :  { %v1373_v45 = vmul.f32 %v1372_v42, %v3745_v44  ;;  %v3392_v42 = vmov 23  }
 0xbc7   :  { %v1374_v28 = vadd.f32 %v1373_v45, %v1356_v34  ;;  %v1480_v45 = vrot.slane %v3741_v39, %v3684_v14 }
 0xbc9   :  { %3266 = vtanh.f32 %v1374_v28 }
 0xbd6   :  { %v3267_v46 = vpop.eup %3266 }
 0xbd7   :  { %1378 = vperm.xlu1 %3217, %v3267_v46  }
 0xbdb   :  { %3218 = vset.pattern.permute.xlu1 %v3387_v47 }
 0xc52   :  { %v3750_v52 = vpop.permute.xlu1 %1378 }
 0xc53   :  { %v1391_v53 = vmul.f32 %v1390_v51, %v3750_v52 }
 0xc55   :  { %v1392_v54 = vadd.f32 %v1391_v53, %v1374_v28  ;;  %v3393_v53 = vmov 24  }
 0xc57   :  { %3268 = vtanh.f32 %v1392_v54 }
 0xc64   :  { %v3269_v56 = vpop.eup %3268 }
 0xc65   :  { %1396 = vperm.xlu1 %3218, %v3269_v56  }
 0xc69   :  { %3220 = vset.pattern.permute.xlu1 %v3389_v6 }
 0xce0   :  { %v3755_v61 = vpop.permute.xlu1 %1396 }
 0xce1   :  { %v1409_v63 = vmul.f32 %v1408_v60, %v3755_v61 }
 0xce3   :  { %v1410_v3 = vadd.f32 %v1409_v63, %v1392_v54  ;;  %v1498_v54 = vrot.slane %v3741_v39, %v3692_v21 }
 0xce5   :  { %3270 = vtanh.f32 %v1410_v3 }
 0xcf2   :  { %v3271_v5 = vpop.eup %3270 }
 0xcf3   :  { %1414 = vperm.xlu0 %3219, %v3271_v5   ;;  %v1049_v5 = vld [vmem:[#allocation2 + $0x18] sm:$0xff] }
 0xcf4   :  { %v1516_v6 = vrot.slane %v1049_v5, %v3634_v33 }
 0xcf7   :  { %3222 = vset.pattern.permute.xlu0 %v3391_v26  ;;  %v3396_v26 = vmov 27  }
 0xd6e   :  { %v3760_v10 = vpop.permute.xlu0 %1414 }
 0xd6f   :  { %v1427_v11 = vmul.f32 %v1426_v8, %v3760_v10 }
 0xd71   :  { %v1428_v13 = vadd.f32 %v1427_v11, %v1410_v3  ;;  %v3394_v3 = vmov 25  }
 0xd73   :  { %3272 = vtanh.f32 %v1428_v13 }
 0xd80   :  { %v3273_v15 = vpop.eup %3272 }
 0xd81   :  { %1432 = vperm.xlu1 %3220, %v3273_v15   ;;  %v3395_v15 = vmov 26  }
 0xd85   :  { %3221 = vset.pattern.permute.xlu1 %v3390_v17  ;;  %v1534_v17 = vrot.slane %v1049_v5, %v3644_v41 }
 0xdfc   :  { %v3765_v19 = vpop.permute.xlu1 %1432 }
 0xdfd   :  { %v1445_v22 = vmul.f32 %v1444_v18, %v3765_v19 }
 0xdff   :  { %v1446_v24 = vadd.f32 %v1445_v22, %v1428_v13 }
 0xe01   :  { %3274 = vtanh.f32 %v1446_v24 }
 0xe0e   :  { %v3275_v25 = vpop.eup %3274 }
 0xe0f   :  { %1450 = vperm.xlu1 %3221, %v3275_v25  }
 0xe13   :  { %3223 = vset.pattern.permute.xlu1 %v3392_v42 }
 0xe8a   :  { %v3770_v35 = vpop.permute.xlu1 %1450 }
 0xe8b   :  { %v1463_v34 = vmul.f32 %v1462_v27, %v3770_v35  ;;  %v1552_v27 = vrot.slane %v1049_v5, %v3652_v48 }
 0xe8d   :  { %v1464_v37 = vadd.f32 %v1463_v34, %v1446_v24 }
 0xe8f   :  { %3276 = vtanh.f32 %v1464_v37 }
 0xe9c   :  { %v3277_v38 = vpop.eup %3276 }
 0xe9d   :  { %1468 = vperm.xlu0 %3222, %v3277_v38  }
 0xea1   :  { %3225 = vset.pattern.permute.xlu0 %v3394_v3 }
 0xf18   :  { %v3775_v28 = vpop.permute.xlu0 %1468 }
 0xf19   :  { %v1481_v46 = vmul.f32 %v1480_v45, %v3775_v28  ;;  %v3397_v45 = vmov 28  }
 0xf1b   :  { %v1482_v47 = vadd.f32 %v1481_v46, %v1464_v37  ;;  %v1570_v46 = vrot.slane %v1049_v5, %v3660_v55 }
 0xf1d   :  { %3278 = vtanh.f32 %v1482_v47 }
 0xf2a   :  { %v3279_v51 = vpop.eup %3278 }
 0xf2b   :  { %1486 = vperm.xlu1 %3223, %v3279_v51  }
 0xf2f   :  { %3224 = vset.pattern.permute.xlu1 %v3393_v53 }
 0xfa6   :  { %v3780_v56 = vpop.permute.xlu1 %1486 }
 0xfa7   :  { %v1499_v59 = vmul.f32 %v1498_v54, %v3780_v56 }
 0xfa9   :  { %v1500_v60 = vadd.f32 %v1499_v59, %v1482_v47  ;;  %v3398_v59 = vmov 29  }
 0xfab   :  { %3280 = vtanh.f32 %v1500_v60 }
 0xfb8   :  { %v3281_v63 = vpop.eup %3280 }
 0xfb9   :  { %1504 = vperm.xlu1 %3224, %v3281_v63  }
 0xfbd   :  { %3226 = vset.pattern.permute.xlu1 %v3395_v15 }
0x1034   :  { %v3784_v8 = vpop.permute.xlu1 %1504 }
0x1035   :  { %v1517_v11 = vmul.f32 %v1516_v6, %v3784_v8 }
0x1037   :  { %v1518_v13 = vadd.f32 %v1517_v11, %v1500_v60  ;;  %v1588_v60 = vrot.slane %v1049_v5, %v3668_v62 }
0x1039   :  { %3282 = vtanh.f32 %v1518_v13 }
0x1046   :  { %v3283_v39 = vpop.eup %3282 }
0x1047   :  { %1522 = vperm.xlu0 %3225, %v3283_v39   ;;  %v1606_v39 = vrot.slane %v1049_v5, %v3676_v7 }
0x104b   :  { %3228 = vset.pattern.permute.xlu0 %v3397_v45  ;;  %v1657_v45 = vld [vmem:[#allocation4 + $0x40] sm:$0xf] }
0x10c2   :  { %v3788_v18 = vpop.permute.xlu0 %1522 }
0x10c3   :  { %v1535_v22 = vmul.f32 %v1534_v17, %v3788_v18 }
0x10c5   :  { %v1536_v24 = vadd.f32 %v1535_v22, %v1518_v13  ;;  %v3399_v13 = vmov 30  }
0x10c7   :  { %3284 = vtanh.f32 %v1536_v24 }
0x10d4   :  { %v3285_v25 = vpop.eup %3284 }
0x10d5   :  { %1540 = vperm.xlu1 %3226, %v3285_v25   ;;  %v3400_v25 = vmov 31  }
0x10d9   :  { %3227 = vset.pattern.permute.xlu1 %v3396_v26  ;;  %v1624_v26 = vrot.slane %v1049_v5, %v3684_v14 }
0x1150   :  { %v3792_v34 = vpop.permute.xlu1 %1540 }
0x1151   :  { %v1553_v37 = vmul.f32 %v1552_v27, %v3792_v34 }
0x1153   :  { %v1554_v38 = vadd.f32 %v1553_v37, %v1536_v24 }
0x1155   :  { %3286 = vtanh.f32 %v1554_v38 }
0x1162   :  { %v3287_v42 = vpop.eup %3286 }
0x1163   :  { %1558 = vperm.xlu1 %3227, %v3287_v42  }
0x1167   :  { %3229 = vset.pattern.permute.xlu1 %v3398_v59 }
0x11de   :  { %v3796_v47 = vpop.permute.xlu1 %1558 }
0x11df   :  { %v1571_v51 = vmul.f32 %v1570_v46, %v3796_v47  ;;  %v1656_v46 = vld [vmem:[#allocation4 + $0x38] sm:$0xff] }
0x11e1   :  { %v1572_v53 = vadd.f32 %v1571_v51, %v1554_v38  ;;  %v1655_v51 = vld [vmem:[#allocation4 + $0x30] sm:$0xff] }
0x11e2   :  { %v3814_v59 = vand.u32 4294901760, %v1655_v51 }
0x11e3   :  { %3288 = vtanh.f32 %v1572_v53 }
0x11f0   :  { %v3289_v54 = vpop.eup %3288 }
0x11f1   :  { %1576 = vperm.xlu0 %3228, %v3289_v54   ;;  %v3812_v54 = vand.u32 4294901760, %v1656_v46 }
0x11f5   :  { %3231 = vset.pattern.permute.xlu0 %v3400_v25 }
0x126c   :  { %v3800_v63 = vpop.permute.xlu0 %1576 }
0x126d   :  { %v1589_v3 = vmul.f32 %v1588_v60, %v3800_v63  ;;  %v1654_v60 = vld [vmem:[#allocation4 + $0x28] sm:$0xff] }
0x126f   :  { %v1590_v6 = vadd.f32 %v1589_v3, %v1572_v53  ;;  %v1663_v53 = vsel %vm544_vm3, %v1657_v45, 0  ;;  %v1653_v3 = vld [vmem:[#allocation4 + $0x20] sm:$0xff] }
0x1270   :  { %v3816_v5 = vand.u32 4294901760, %v1663_v53 }
0x1271   :  { %3290 = vtanh.f32 %v1590_v6 }
0x1272   :  { %2968 = vmatpush3.msra.mxu0 %v3816_v5 }
0x1273   :  { %2969 = vmatprep.subr.mxu0 %v4226_v0 }
0x1274   :  { %2970 = vmatpush3.msra.mxu0 %v3812_v54 }
0x1275   :  { %2971 = vmatprep.subr.mxu0 %v4226_v0 }
0x1276   :  { %2972 = vmatpush3.msra.mxu0 %v3814_v59 }
0x1277   :  { %2973 = vmatprep.subr.mxu0 %v4226_v0 }
0x127e   :  { %v3291_v11 = vpop.eup %3290 }
0x127f   :  { %1594 = vperm.xlu1 %3229, %v3291_v11   ;;  %v3820_v11 = vand.u32 4294901760, %v1653_v3 }
0x1281   :  { %4238 = vst [vmem:[#allocation9_spill] sm:$0xff] %v3820_v11 }
0x1283   :  { %3230 = vset.pattern.permute.xlu1 %v3399_v13  ;;  %v3823_v13 = vsub.f32 %v1656_v46, %v3812_v54 }
0x1285   :  { %4239 = vst [vmem:[#allocation10_spill] sm:$0xff] %v3823_v13  ;;  %v4221_v25 = vand.u32 4294901760, %v3823_v13 }
0x12fa   :  { %v3804_v15 = vpop.permute.xlu1 %1594 }
0x12fb   :  { %v1607_v17 = vmul.f32 %v1606_v39, %v3804_v15  ;;  %v3826_v39 = vsub.f32 %v1655_v51, %v3814_v59 }
0x12fd   :  { %v1608_v22 = vadd.f32 %v1607_v17, %v1590_v6  ;;  %v3818_v6 = vand.u32 4294901760, %v1654_v60  ;;  %4240 = vst [vmem:[#allocation11_spill] sm:$0xff] %v3826_v39  ;;  %v3829_v17 = vsub.f32 %v1663_v53, %v3816_v5 }
0x12ff   :  { %3292 = vtanh.f32 %v1608_v22  ;;  %2974 = vmatpush3.msra.mxu0 %v3818_v6 }
0x1300   :  { %2975 = vmatprep.subr.mxu0 %v4226_v0 }
0x1301   :  { %2976 = vmatpush3.msra.mxu0 %v3820_v11 }
0x1302   :  { %2977 = vmatprep.subr.mxu0 %v4226_v0 }
0x130c   :  { %v3293_v24 = vpop.eup %3292 }
0x130d   :  { %1612 = vperm.xlu1 %3230, %v3293_v24   ;;  %v3836_v24 = vsub.f32 %v1653_v3, %v3820_v11 }
0x130f   :  { %4242 = vst [vmem:[#allocation13_spill] sm:$0xff] %v3836_v24  ;;  %v4223_v51 = vand.u32 4294901760, %v3836_v24 }
0x1388   :  { %v3808_v27 = vpop.permute.xlu1 %1612 }
0x1389   :  { %v1625_v37 = vmul.f32 %v1624_v26, %v3808_v27  ;;  %v4222_v26 = vand.u32 4294901760, %v3826_v39 }
0x138b   :  { %v1626_v38 = vadd.f32 %v1625_v37, %v1608_v22  ;;  %v3832_v22 = vsub.f32 %v1654_v60, %v3818_v6  ;;  %v4225_v37 = vand.u32 4294901760, %v3829_v17  ;;  %v1781_v46 = vsub.f32 %v3826_v39, %v4222_v26 }
0x138c   :  { %v1795_v26 = vsub.f32 %v3836_v24, %v4223_v51  ;;  %v4243_v39 = vmov 0.0  }
0x138d   :  { %3294 = vtanh.f32 %v1626_v38  ;;  %4241 = vst [vmem:[#allocation12_spill] sm:$0xff] %v3832_v22  ;;  %v4224_v38 = vand.u32 4294901760, %v3832_v22  ;;  %v1767_v45 = vsub.f32 %v3829_v17, %v4225_v37 }
0x138f   :  { %v1768_v53 = vand.u32 4294901760, %v1767_v45  ;;  %v1788_v3 = vsub.f32 %v3832_v22, %v4224_v38  ;;  %v1796_v45 = vand.u32 4294901760, %v1795_v26 }
0x1391   :  { %2989 = vmatpush3.msra.mxu1 %v1768_v53 }
0x1392   :  { %2990 = vmatprep.subr.mxu1 %v4226_v0 }
0x139a   :  { %v3295_v42 = vpop.eup %3294 }
0x139b   :  { %1630 = vperm.xlu0 %3231, %v3295_v42   ;;  %v1774_v42 = vsub.f32 %v3823_v13, %v4221_v25  ;;  %v1782_v25 = vand.u32 4294901760, %v1781_v46  ;;  %v3873_v46 = vand.u32 127, %v1050_v31 }
0x139d   :  { %v1775_v60 = vand.u32 4294901760, %v1774_v42  ;;  %v1789_v42 = vand.u32 4294901760, %v1788_v3  ;;  %vm1057_vm6 = vcmp.eq.s32.totalorder %v3631_v32, %v3873_v46 }
0x139e   :  { %v2717_v53 = vsel %vm1057_vm6, 1.0, %v4226_v0 }
0x139f   :  { %2991 = vmatpush3.msra.mxu1 %v1775_v60  ;;  %v1096_v60 = vrot.slane %v2717_v53, %v3644_v41  ;;  %v1114_v26 = vrot.slane %v2717_v53, %v3652_v48  ;;  %v1150_v38 = vrot.slane %v2717_v53, %v3668_v62  ;;  %v1168_v24 = vrot.slane %v2717_v53, %v3676_v7 }
0x13a0   :  { %2992 = vmatprep.subr.mxu1 %v4226_v0 }
0x13a1   :  { %2993 = vmatpush3.msra.mxu1 %v1782_v25  ;;  %v1078_v25 = vrot.slane %v2717_v53, %v3634_v33  ;;  %v1097_v3 = vmul.f32 %v1096_v60, %v3648_v43  ;;  %v1115_v51 = vmul.f32 %v1114_v26, %v3656_v50  ;;  %v1151_v43 = vmul.f32 %v1150_v38, %v3672_v2 }
0x13a2   :  { %2994 = vmatprep.subr.mxu1 %v4226_v0  ;;  %v1186_v60 = vrot.slane %v2717_v53, %v3684_v14  ;;  %v1204_v50 = vrot.slane %v2717_v53, %v3692_v21 }
0x13a3   :  { %2995 = vmatpush3.msra.mxu1 %v1789_v42  ;;  %v1132_v42 = vrot.slane %v2717_v53, %v3660_v55  ;;  %v1079_v31 = vmul.f32 %v1078_v25, %v3640_v36  ;;  %v1169_v36 = vmul.f32 %v1168_v24, %v3680_v9 }
0x13a4   :  { %2996 = vmatprep.subr.mxu1 %v4226_v0  ;;  %v1187_v26 = vmul.f32 %v1186_v60, %v3688_v16 }
0x13a5   :  { %2997 = vmatpush3.msra.mxu1 %v1796_v45  ;;  %v1052_v45 = vadd.s32 8, %v3631_v32  ;;  %v1098_v37 = vadd.f32 %v1097_v3, %v1079_v31 }
0x13a6   :  { %2998 = vmatprep.subr.mxu1 %v4226_v0  ;;  %v1133_v0 = vmul.f32 %v1132_v42, %v3664_v57  ;;  %v1205_v42 = vmul.f32 %v1204_v50, %v3696_v23 }
0x13a7   :  { %vm1058_vm7 = vcmp.eq.s32.totalorder %v1052_v45, %v3873_v46  ;;  %v1116_v22 = vadd.f32 %v1115_v51, %v1098_v37 }
0x13a8   :  { %v2718_v13 = vsel %vm1058_vm7, 1.0, %v4243_v39 }
0x13a9   :  { %v1134_v11 = vadd.f32 %v1133_v0, %v1116_v22  ;;  %v1222_v57 = vrot.slane %v2718_v13, %v3634_v33  ;;  %v1240_v37 = vrot.slane %v2718_v13, %v3644_v41  ;;  %v1258_v51 = vrot.slane %v2718_v13, %v3652_v48 }
0x13aa   :  { %v1276_v22 = vrot.slane %v2718_v13, %v3660_v55  ;;  %v1294_v53 = vrot.slane %v2718_v13, %v3668_v62  ;;  %v1312_v31 = vrot.slane %v2718_v13, %v3676_v7 }
0x13ab   :  { %v1152_v25 = vadd.f32 %v1151_v43, %v1134_v11  ;;  %v1223_v38 = vmul.f32 %v1222_v57, %v3703_v30  ;;  %v1241_v9 = vmul.f32 %v1240_v37, %v3708_v40  ;;  %v1053_v11 = vadd.s32 16, %v3631_v32 }
0x13ac   :  { %v1259_v24 = vmul.f32 %v1258_v51, %v3713_v49  ;;  %v1277_v45 = vmul.f32 %v1276_v22, %v3718_v58  ;;  %v1295_v43 = vmul.f32 %v1294_v53, %v3723_v4  ;;  %v1330_v40 = vrot.slane %v2718_v13, %v3684_v14 }
0x13ad   :  { %v1170_v3 = vadd.f32 %v1169_v36, %v1152_v25  ;;  %vm1059_vm8 = vcmp.eq.s32.totalorder %v1053_v11, %v3873_v46  ;;  %v1313_v50 = vmul.f32 %v1312_v31, %v3728_v12  ;;  %v1348_v49 = vrot.slane %v2718_v13, %v3692_v21 }
0x13ae   :  { %v2719_v60 = vsel %vm1059_vm8, 1.0, %v4243_v39  ;;  %v1054_v51 = vadd.s32 24, %v3631_v32 }
0x13af   :  { %v1188_v2 = vadd.f32 %v1187_v26, %v1170_v3  ;;  %v1331_v26 = vmul.f32 %v1330_v40, %v3733_v20  ;;  %v1366_v58 = vrot.slane %v2719_v60, %v3634_v33  ;;  %v1349_v3 = vmul.f32 %v1348_v49, %v3738_v29  ;;  %v1651_v40 = vld [vmem:[#allocation4 + $0x10] sm:$0xff] }
0x13b0   :  { %v1420_v13 = vrot.slane %v2719_v60, %v3660_v55  ;;  %v1456_v11 = vrot.slane %v2719_v60, %v3676_v7  ;;  %vm1060_vm9 = vcmp.eq.s32.totalorder %v1054_v51, %v3873_v46  ;;  %v1492_v53 = vrot.slane %v2719_v60, %v3692_v21  ;;  %v1652_v46 = vld [vmem:[#allocation4 + $0x18] sm:$0xff] }
0x13b1   :  { %v1206_v0 = vadd.f32 %v1205_v42, %v1188_v2  ;;  %v1384_v42 = vrot.slane %v2719_v60, %v3644_v41  ;;  %v1367_v37 = vmul.f32 %v1366_v58, %v3745_v44  ;;  %v1402_v2 = vrot.slane %v2719_v60, %v3652_v48  ;;  %v1649_v58 = vld [vmem:[#allocation4] sm:$0xff] }
0x13b2   :  { %v1421_v22 = vmul.f32 %v1420_v13, %v3760_v10  ;;  %v3938_v31 = vand.u32 4294901760, %v1652_v46 }
0x13b3   :  { %v1224_v16 = vadd.f32 %v1223_v38, %v1206_v0  ;;  %v1385_v12 = vmul.f32 %v1384_v42, %v3750_v52  ;;  %v1403_v0 = vmul.f32 %v1402_v2, %v3755_v61  ;;  %v1474_v52 = vrot.slane %v2719_v60, %v3684_v14 }
0x13b4   :  { %v1457_v61 = vmul.f32 %v1456_v11, %v3770_v35  ;;  %v3944_v35 = vsub.f32 %v1652_v46, %v3938_v31  ;;  %2978 = vmatpush3.msra.mxu0 %v3938_v31  ;;  %v3971_v42 = vand.u32 4294901760, %v1649_v58 }
0x13b5   :  { %v1242_v23 = vadd.f32 %v1241_v9, %v1224_v16  ;;  %v1438_v9 = vrot.slane %v2719_v60, %v3668_v62  ;;  %v1475_v10 = vmul.f32 %v1474_v52, %v3775_v28  ;;  %v3946_v60 = vand.u32 4294901760, %v1651_v40  ;;  %2979 = vmatprep.subr.mxu0 %v4243_v39 }
0x13b7   :  { %v1260_v30 = vadd.f32 %v1259_v24, %v1242_v23  ;;  %v1439_v16 = vmul.f32 %v1438_v9, %v3765_v19  ;;  %v3931_v24 = vsel %vm1060_vm9, 1.0, %v4243_v39  ;;  %2980 = vmatpush3.msra.mxu0 %v3946_v60 }
0x13b8   :  { %2981 = vmatprep.subr.mxu0 %v4243_v39 }
0x13b9   :  { %v1278_v36 = vadd.f32 %v1277_v45, %v1260_v30  ;;  %v1510_v45 = vrot.slane %v3931_v24, %v3634_v33  ;;  %v1493_v30 = vmul.f32 %v1492_v53, %v3780_v56  ;;  %v1801_v56 = vand.u32 4294901760, %v3944_v35 }
0x13bb   :  { %v1296_v25 = vadd.f32 %v1295_v43, %v1278_v36  ;;  %v1528_v43 = vrot.slane %v3931_v24, %v3644_v41  ;;  %v1511_v33 = vmul.f32 %v1510_v45, %v3784_v8  ;;  %v1546_v36 = vrot.slane %v3931_v24, %v3652_v48 }
0x13bc   :  { %v3955_v41 = vsub.f32 %v1651_v40, %v3946_v60  ;;  %v1564_v8 = vrot.slane %v3931_v24, %v3660_v55  ;;  %v1802_v48 = vsub.f32 %v3944_v35, %v1801_v56  ;;  %v1582_v55 = vrot.slane %v3931_v24, %v3668_v62 }
0x13bd   :  { %v1314_v57 = vadd.f32 %v1313_v50, %v1296_v25  ;;  %v1650_v50 = vld [vmem:[#allocation4 + $0x8] sm:$0xff]  ;;  %v1600_v62 = vrot.slane %v3931_v24, %v3676_v7 }
0x13be   :  { %v3957_v49 = vand.u32 4294901760, %v1650_v50  ;;  %v1583_v9 = vmul.f32 %v1582_v55, %v3800_v63 }
0x13bf   :  { %v1332_v4 = vadd.f32 %v1331_v26, %v1314_v57  ;;  %v1529_v26 = vmul.f32 %v1528_v43, %v3788_v18  ;;  %v1808_v57 = vand.u32 4294901760, %v3955_v41  ;;  %v1601_v11 = vmul.f32 %v1600_v62, %v3804_v15 }
0x13c0   :  { %2982 = vmatpush3.msra.mxu0 %v3957_v49 }
0x13c1   :  { %v1350_v38 = vadd.f32 %v1349_v3, %v1332_v4  ;;  %v3969_v3 = vsub.f32 %v1650_v50, %v3957_v49  ;;  %v1547_v4 = vmul.f32 %v1546_v36, %v3792_v34  ;;  %2983 = vmatprep.subr.mxu0 %v4243_v39  ;;  %v1809_v2 = vsub.f32 %v3955_v41, %v1808_v57  ;;  %v4246_v36 = vld [vmem:[#allocation11_spill] sm:$0xff]  ;;  %v4247_v50 = vld [vmem:[#allocation12_spill] sm:$0xff] }
0x13c2   :  { %2984 = vmatpush3.msra.mxu0 %v3971_v42  ;;  %v1565_v34 = vmul.f32 %v1564_v8, %v3796_v47 }
0x13c3   :  { %v1368_v20 = vadd.f32 %v1367_v37, %v1350_v38  ;;  %v1803_v37 = vand.u32 4294901760, %v1802_v48  ;;  %v1815_v38 = vand.u32 4294901760, %v3969_v3  ;;  %3009 = vmatprep.subr.mxu0 %v4243_v39  ;;  %v1810_v51 = vand.u32 4294901760, %v1809_v2  ;;  %v2215_v48 = vld [vmem:[#allocation6] sm:$0xff] }
0x13c5   :  { %v1386_v29 = vadd.f32 %v1385_v12, %v1368_v20  ;;  %v3983_v12 = vsub.f32 %v1649_v58, %v3971_v42  ;;  %2999 = vmatpush3.msra.mxu1 %v1803_v37  ;;  %v1816_v20 = vsub.f32 %v3969_v3, %v1815_v38 }
0x13c6   :  { %3000 = vmatprep.subr.mxu1 %v4243_v39 }
0x13c7   :  { %v1404_v44 = vadd.f32 %v1403_v0, %v1386_v29  ;;  %v1618_v29 = vrot.slane %v3931_v24, %v3684_v14  ;;  %v1822_v47 = vand.u32 4294901760, %v3983_v12  ;;  %3001 = vmatpush3.msra.mxu1 %v1810_v51  ;;  %v1817_v7 = vand.u32 4294901760, %v1816_v20 }
0x13c8   :  { %3002 = vmatprep.subr.mxu1 %v4243_v39  ;;  %v1636_v14 = vrot.slane %v3931_v24, %v3692_v21  ;;  %v3296_v21 = vld [vmem:[%s4214_s2] sm:$0xff] }
0x13c9   :  { %v1422_v32 = vadd.f32 %v1421_v22, %v1404_v44  ;;  %v1823_v44 = vsub.f32 %v3983_v12, %v1822_v47  ;;  %3003 = vmatpush3.msra.mxu1 %v1817_v7 }
0x13ca   :  { %3004 = vmatprep.subr.mxu1 %v4243_v39 }
0x13cb   :  { %v1440_v23 = vadd.f32 %v1439_v16, %v1422_v32  ;;  %v1619_v16 = vmul.f32 %v1618_v29, %v3808_v27  ;;  %v1824_v52 = vand.u32 4294901760, %v1823_v44 }
0x13cd   :  { %v1458_v19 = vadd.f32 %v1457_v61, %v1440_v23  ;;  %3005 = vmatpush3.msra.mxu1 %v1824_v52 }
0x13ce   :  { %3030 = vmatprep.subr.mxu1 %v4243_v39 }
0x13cf   :  { %v1476_v28 = vadd.f32 %v1475_v10, %v1458_v19 }
0x13d1   :  { %v1494_v25 = vadd.f32 %v1493_v30, %v1476_v28  ;;  %v4244_v28 = vld [vmem:[#allocation9_spill] sm:$0xff] }
0x13d3   :  { %v1512_v18 = vadd.f32 %v1511_v33, %v1494_v25  ;;  %v4245_v33 = vld [vmem:[#allocation10_spill] sm:$0xff]  ;;  %v4248_v25 = vld [vmem:[#allocation13_spill] sm:$0xff] }
0x13d5   :  { %v1530_v13 = vadd.f32 %v1529_v26, %v1512_v18  ;;  %v4137_v18 = vand.u32 4294901760, %v2215_v48 }
0x13d7   :  { %v1548_v0 = vadd.f32 %v1547_v4, %v1530_v13  ;;  %v4146_v2 = vsub.f32 %v2215_v48, %v4137_v18 }
0x13d9   :  { %v1566_v22 = vadd.f32 %v1565_v34, %v1548_v0  ;;  %v2349_v13 = vand.u32 4294901760, %v4146_v2 }
0x13db   :  { %v1584_v63 = vadd.f32 %v1583_v9, %v1566_v22  ;;  %v2350_v62 = vsub.f32 %v4146_v2, %v2349_v13 }
0x13dd   :  { %v1602_v32 = vadd.f32 %v1601_v11, %v1584_v63  ;;  %v2351_v51 = vand.u32 4294901760, %v2350_v62 }
0x13df   :  { %v1620_v15 = vadd.f32 %v1619_v16, %v1602_v32 }
0x1416   :  { %v1631_v61 = vpop.permute.xlu0 %1630 }
0x1417   :  { %v1637_v53 = vmul.f32 %v1636_v14, %v1631_v61 }
0x1419   :  { %v1638_v23 = vadd.f32 %v1637_v53, %v1620_v15 }
0x141b   :  { %1640 = vrot.lane.b32.xlu1 %v1638_v23, %s3368_s10 }
0x141f   :  { %1643 = vrot.lane.b32.xlu1 %v3565_v1, %s3401_s0 }
0x148d   :  { %v1641_v27 = vpop.permute.xlu1 %1640 }
0x148e   :  { %v1646_v24 = vsel %vm533_vm4, %v3296_v21, %v1641_v27 }
0x1491   :  { %v1644_v10 = vpop.permute.xlu1 %1643 }
0x1492   :  { %v1648_v45 = vsel %vm1647_vm10, %v1646_v24, %v1644_v10 }
0x1493   :  { %v1660_v46 = vsel %vm1658_vm11, %v1648_v45, 0 }
0x1494   :  { %v4014_v19 = vand.u32 4294901760, %v1660_v46 }
0x1496   :  { %v1740_v30 = vsub.f32 %v1660_v46, %v4014_v19  ;;  %3007 = vmatmul.mubr.f32.vlgmr.msra.gmra.mxu1 %v4014_v19 }
0x1497   :  { %3031 = vmatpush3.msra.mxu1 %v3816_v5  ;;  %3048 = vmatprep.mubr.msk.f32.mxu1 %vm3367_vm0, %v4243_v39 }
0x1498   :  { %v1741_v1 = vand.u32 4294901760, %v1740_v30  ;;  %3032 = vmatprep.subr.mxu1 %v4243_v39 }
0x1499   :  { %3033 = vmatpush3.msra.mxu1 %v3812_v54 }
0x149a   :  { %3034 = vmatprep.subr.mxu1 %v4243_v39  ;;  %v1742_v43 = vsub.f32 %v1740_v30, %v1741_v1 }
0x149b   :  { %3035 = vmatpush3.msra.mxu1 %v3814_v59 }
0x149c   :  { %3036 = vmatprep.subr.mxu1 %v4243_v39  ;;  %v1743_v40 = vand.u32 4294901760, %v1742_v43 }
0x149d   :  { %3037 = vmatpush3.msra.mxu1 %v3818_v6 }
0x149e   :  { %3038 = vmatprep.subr.mxu1 %v4243_v39  ;;  %2986 = vmatmul.mubr.f32.vlgmr.msra.gmra.mxu0 %v1743_v40 }
0x149f   :  { %3010 = vmatpush3.msra.mxu0 %v3829_v17  ;;  %3039 = vmatpush3.msra.mxu1 %v4244_v28 }
0x14a0   :  { %3011 = vmatprep.subr.mxu0 %v4243_v39  ;;  %3040 = vmatprep.subr.mxu1 %v4243_v39 }
0x14a1   :  { %3012 = vmatpush3.msra.mxu0 %v4245_v33  ;;  %3041 = vmatpush3.msra.mxu1 %v3938_v31 }
0x14a2   :  { %3013 = vmatprep.subr.mxu0 %v4243_v39  ;;  %3042 = vmatprep.subr.mxu1 %v4243_v39 }
0x14a3   :  { %3014 = vmatpush3.msra.mxu0 %v4246_v36  ;;  %3043 = vmatpush3.msra.mxu1 %v3946_v60 }
0x14a4   :  { %3015 = vmatprep.subr.mxu0 %v4243_v39  ;;  %3044 = vmatprep.subr.mxu1 %v4243_v39 }
0x14a5   :  { %3016 = vmatpush3.msra.mxu0 %v4247_v50  ;;  %3045 = vmatpush3.msra.mxu1 %v3957_v49 }
0x14a6   :  { %3017 = vmatprep.subr.mxu0 %v4243_v39  ;;  %3046 = vmatprep.subr.mxu1 %v4243_v39 }
0x14a7   :  { %3018 = vmatpush3.msra.mxu0 %v4248_v25  ;;  %3047 = vmatpush3.msra.mxu1 %v3971_v42 }
0x14a8   :  { %3019 = vmatprep.subr.mxu0 %v4243_v39  ;;  %3049 = vmatmul.mubr.f32.vlgmr.msra.gmra.mxu1 %v1741_v1 }
0x14a9   :  { %3072 = vmatprep.subr.mxu1 %v4243_v39  ;;  %3020 = vmatpush3.msra.mxu0 %v3944_v35 }
0x14aa   :  { %3073 = vmatpush3.msra.mxu1 %v3816_v5  ;;  %3021 = vmatprep.subr.mxu0 %v4243_v39  ;;  %v4251_v5 = vand.u32 4294901760, %v4246_v36 }
0x14ab   :  { %3074 = vmatprep.subr.mxu1 %v4243_v39  ;;  %3022 = vmatpush3.msra.mxu0 %v3955_v41 }
0x14ac   :  { %3075 = vmatpush3.msra.mxu1 %v3812_v54  ;;  %3023 = vmatprep.subr.mxu0 %v4243_v39  ;;  %v4249_v54 = vand.u32 4294901760, %v3829_v17  ;;  %v4253_v17 = vand.u32 4294901760, %v4248_v25 }
0x14ad   :  { %3076 = vmatprep.subr.mxu1 %v4243_v39  ;;  %3024 = vmatpush3.msra.mxu0 %v3969_v3 }
0x14ae   :  { %3077 = vmatpush3.msra.mxu1 %v3814_v59  ;;  %3025 = vmatprep.subr.mxu0 %v4243_v39  ;;  %v4250_v59 = vand.u32 4294901760, %v4245_v33 }
0x14af   :  { %3078 = vmatprep.subr.mxu1 %v4243_v39  ;;  %3026 = vmatpush3.msra.mxu0 %v3983_v12 }
0x14b0   :  { %3027 = vmatprep.mubr.msk.f32.mxu0 %vm3367_vm0, %v4243_v39  ;;  %3079 = vmatpush3.msra.mxu1 %v3818_v6  ;;  %v4252_v6 = vand.u32 4294901760, %v4247_v50 }
0x14b1   :  { %3028 = vmatmul.mubr.f32.vlgmr.msra.gmra.mxu0 %v1740_v30  ;;  %3051 = vmatprep.subr.mxu0 %v4243_v39 }
0x14b2   :  { %3080 = vmatprep.subr.mxu1 %v4243_v39  ;;  %3052 = vmatpush3.msra.mxu0 %v4249_v54 }
0x14b3   :  { %3081 = vmatpush3.msra.mxu1 %v4244_v28  ;;  %3053 = vmatprep.subr.mxu0 %v4243_v39 }
0x14b4   :  { %3082 = vmatprep.subr.mxu1 %v4243_v39  ;;  %3054 = vmatpush3.msra.mxu0 %v4250_v59 }
0x14b5   :  { %3083 = vmatpush3.msra.mxu1 %v3938_v31  ;;  %3055 = vmatprep.subr.mxu0 %v4243_v39  ;;  %v2218_v31 = vld [vmem:[#allocation6 + $0x18] sm:$0xff] }
0x14b6   :  { %3084 = vmatprep.subr.mxu1 %v4243_v39  ;;  %3056 = vmatpush3.msra.mxu0 %v4251_v5  ;;  %v4113_v35 = vand.u32 4294901760, %v2218_v31 }
0x14b7   :  { %3085 = vmatpush3.msra.mxu1 %v3946_v60  ;;  %3057 = vmatprep.subr.mxu0 %v4243_v39  ;;  %v2217_v60 = vld [vmem:[#allocation6 + $0x10] sm:$0xff] }
0x14b8   :  { %3086 = vmatprep.subr.mxu1 %v4243_v39  ;;  %3058 = vmatpush3.msra.mxu0 %v4252_v6  ;;  %v4118_v41 = vand.u32 4294901760, %v2217_v60 }
0x14b9   :  { %3087 = vmatpush3.msra.mxu1 %v3957_v49  ;;  %3059 = vmatprep.subr.mxu0 %v4243_v39  ;;  %v2216_v49 = vld [vmem:[#allocation6 + $0x8] sm:$0xff] }
0x14ba   :  { %3088 = vmatprep.subr.mxu1 %v4243_v39  ;;  %3060 = vmatpush3.msra.mxu0 %v4253_v17  ;;  %v4124_v8 = vsub.f32 %v2217_v60, %v4118_v41  ;;  %v4126_v58 = vand.u32 4294901760, %v2216_v49 }
0x14bb   :  { %3089 = vmatpush3.msra.mxu1 %v3971_v42  ;;  %3090 = vmatprep.mubr.msk.f32.mxu1 %vm3367_vm0, %v4243_v39 }
0x14bc   :  { %3061 = vmatprep.subr.mxu0 %v4243_v39  ;;  %3091 = vmatmul.mubr.f32.vlgmr.msra.gmra.mxu1 %v4014_v19  ;;  %v2335_v3 = vand.u32 4294901760, %v4124_v8  ;;  %v4135_v42 = vsub.f32 %v2216_v49, %v4126_v58 }
0x14bd   :  { %3062 = vmatpush3.msra.mxu0 %v1801_v56  ;;  %3069 = vmatprep.mubr.msk.f32.mxu0 %vm3367_vm0, %v4243_v39  ;;  %v4116_v56 = vsub.f32 %v2218_v31, %v4113_v35 }
0x14be   :  { %3063 = vmatprep.subr.mxu0 %v4243_v39  ;;  %3104 = vmatprep.subr.mxu1 %v4243_v39  ;;  %v2336_v55 = vsub.f32 %v4124_v8, %v2335_v3  ;;  %v2342_v37 = vand.u32 4294901760, %v4135_v42 }
0x14bf   :  { %3064 = vmatpush3.msra.mxu0 %v1808_v57  ;;  %3112 = vmatprep.mubr.msk.f32.mxu1 %vm3367_vm0, %v4243_v39  ;;  %v2328_v26 = vand.u32 4294901760, %v4116_v56 }
0x14c0   :  { %3065 = vmatprep.subr.mxu0 %v4243_v39  ;;  %v2343_v12 = vsub.f32 %v4135_v42, %v2342_v37 }
0x14c1   :  { %3066 = vmatpush3.msra.mxu0 %v1815_v38  ;;  %v2329_v57 = vsub.f32 %v4116_v56, %v2328_v26  ;;  %v2337_v38 = vand.u32 4294901760, %v2336_v55 }
0x14c2   :  { %3067 = vmatprep.subr.mxu0 %v4243_v39  ;;  %v2344_v34 = vand.u32 4294901760, %v2343_v12 }
0x14c3   :  { %3068 = vmatpush3.msra.mxu0 %v1822_v47  ;;  %v2330_v4 = vand.u32 4294901760, %v2329_v57 }
0x14c4   :  { %3070 = vmatmul.mubr.f32.vlgmr.msra.gmra.mxu0 %v4014_v19  ;;  %3093 = vmatprep.subr.mxu0 %v4243_v39 }
0x14c5   :  { %3101 = vmatprep.mubr.msk.f32.mxu0 %vm3367_vm0, %v4243_v39  ;;  %3094 = vmatpush3.msra.mxu0 %v4113_v35 }
0x14c6   :  { %3095 = vmatprep.subr.mxu0 %v4243_v39  ;;  %3105 = vmatpush3.msra.mxu1 %v2330_v4 }
0x14c7   :  { %3096 = vmatpush3.msra.mxu0 %v4118_v41  ;;  %3106 = vmatprep.subr.mxu1 %v4243_v39 }
0x14c8   :  { %3097 = vmatprep.subr.mxu0 %v4243_v39  ;;  %3107 = vmatpush3.msra.mxu1 %v2337_v38 }
0x14c9   :  { %3098 = vmatpush3.msra.mxu0 %v4126_v58  ;;  %3108 = vmatprep.subr.mxu1 %v4243_v39 }
0x14ca   :  { %3099 = vmatprep.subr.mxu0 %v4243_v39  ;;  %3109 = vmatpush3.msra.mxu1 %v2344_v34 }
0x14cb   :  { %3100 = vmatpush3.msra.mxu0 %v4137_v18  ;;  %3110 = vmatprep.subr.mxu1 %v4243_v39 }
0x14cc   :  { %3115 = vmatprep.subr.mxu0 %v4243_v39  ;;  %3111 = vmatpush3.msra.mxu1 %v2351_v51 }
0x14cd   :  { %3126 = vmatprep.subr.mxu1 %v4243_v39 }
0x1556   :  { %v1861_v20 = vpop.f32.mrf.mxu1 }
0x1558   :  { %v3008_v0 = vpop.f32.mrf.mxu1 }
0x155e   :  { %v1745_v9 = vpop.f32.mrf.mxu0 }
0x155f   :  { %v1862_v63 = vadd.f32 %v1861_v20, %v1745_v9 }
0x1560   :  { %v2987_v29 = vpop.f32.mrf.mxu0 }
0x1568   :  { %v2033_v47 = vpop.f32.mrf.mxu1 }
0x156a   :  { %v3050_v7 = vpop.f32.mrf.mxu1 }
0x1571   :  { %v1951_v22 = vpop.f32.mrf.mxu0 }
0x1572   :  { %v1952_v14 = vadd.f32 %v1951_v22, %v1862_v63 }
0x1573   :  { %v3029_v11 = vpop.f32.mrf.mxu0 }
0x1574   :  { %v2034_v52 = vadd.f32 %v2033_v47, %v1952_v14 }
0x157c   :  { %v2211_v44 = vpop.f32.mrf.mxu1 }
0x157e   :  { %v3092_v16 = vpop.f32.mrf.mxu1 }
0x1584   :  { %v2131_v32 = vpop.f32.mrf.mxu0 }
0x1585   :  { %v2132_v61 = vadd.f32 %v2131_v32, %v2034_v52 }
0x1586   :  { %v3071_v15 = vpop.f32.mrf.mxu0 }
0x1587   :  { %v4161_v53 = vadd.f32 %v2211_v44, %v2132_v61 }
0x1589   :  { %v2220_v23 = vsel %vm533_vm4, %v4161_v53, 0 }
0x158a   :  { %v2291_v27 = vand.u32 4294901760, %v2220_v23 }
0x158c   :  { %v2292_v21 = vsub.f32 %v2220_v23, %v2291_v27  ;;  %3113 = vmatmul.mubr.f32.vlgmr.msra.gmra.mxu1 %v2291_v27 }
0x158d   :  { %3127 = vmatpush3.msra.mxu1 %v4113_v35  ;;  %3134 = vmatprep.mubr.msk.f32.mxu1 %vm3367_vm0, %v4243_v39 }
0x158e   :  { %3128 = vmatprep.subr.mxu1 %v4243_v39  ;;  %v2293_v24 = vand.u32 4294901760, %v2292_v21 }
0x158f   :  { %3129 = vmatpush3.msra.mxu1 %v4118_v41 }
0x1590   :  { %3130 = vmatprep.subr.mxu1 %v4243_v39  ;;  %v2294_v10 = vsub.f32 %v2292_v21, %v2293_v24 }
0x1591   :  { %3131 = vmatpush3.msra.mxu1 %v4126_v58 }
0x1592   :  { %3132 = vmatprep.subr.mxu1 %v4243_v39  ;;  %v2295_v45 = vand.u32 4294901760, %v2294_v10 }
0x1593   :  { %3133 = vmatpush3.msra.mxu1 %v4137_v18 }
0x1594   :  { %3135 = vmatmul.mubr.f32.vlgmr.msra.gmra.mxu1 %v2293_v24  ;;  %3148 = vmatprep.subr.mxu1 %v4243_v39 }
0x1595   :  { %3102 = vmatmul.mubr.f32.vlgmr.msra.gmra.mxu0 %v2295_v45  ;;  %3149 = vmatpush3.msra.mxu1 %v4113_v35 }
0x1596   :  { %3116 = vmatpush3.msra.mxu0 %v4116_v56  ;;  %3150 = vmatprep.subr.mxu1 %v4243_v39 }
0x1597   :  { %3117 = vmatprep.subr.mxu0 %v4243_v39  ;;  %3151 = vmatpush3.msra.mxu1 %v4118_v41 }
0x1598   :  { %3118 = vmatpush3.msra.mxu0 %v4124_v8  ;;  %3152 = vmatprep.subr.mxu1 %v4243_v39 }
0x1599   :  { %3119 = vmatprep.subr.mxu0 %v4243_v39  ;;  %3153 = vmatpush3.msra.mxu1 %v4126_v58 }
0x159a   :  { %3120 = vmatpush3.msra.mxu0 %v4135_v42  ;;  %3154 = vmatprep.subr.mxu1 %v4243_v39 }
0x159b   :  { %3121 = vmatprep.subr.mxu0 %v4243_v39  ;;  %3123 = vmatprep.mubr.msk.f32.mxu0 %vm3367_vm0, %v4243_v39 }
0x159c   :  { %3122 = vmatpush3.msra.mxu0 %v4146_v2  ;;  %3155 = vmatpush3.msra.mxu1 %v4137_v18 }
0x159d   :  { %3156 = vmatprep.mubr.msk.f32.mxu1 %vm3367_vm0, %v4243_v39  ;;  %3124 = vmatmul.mubr.f32.vlgmr.msra.gmra.mxu0 %v2292_v21 }
0x159e   :  { %3137 = vmatprep.subr.mxu0 %v4243_v39  ;;  %3157 = vmatmul.mubr.f32.vlgmr.msra.gmra.mxu1 %v2291_v27 }
0x159f   :  { %3138 = vmatpush3.msra.mxu0 %v2328_v26  ;;  %3145 = vmatprep.mubr.msk.f32.mxu0 %vm3367_vm0, %v4243_v39 }
0x15a0   :  { %3139 = vmatprep.subr.mxu0 %v4243_v39 }
0x15a1   :  { %3140 = vmatpush3.msra.mxu0 %v2335_v3 }
0x15a2   :  { %3141 = vmatprep.subr.mxu0 %v4243_v39 }
0x15a3   :  { %3142 = vmatpush3.msra.mxu0 %v2342_v37 }
0x15a4   :  { %3143 = vmatprep.subr.mxu0 %v4243_v39 }
0x15a5   :  { %3144 = vmatpush3.msra.mxu0 %v2349_v13 }
0x15a6   :  { %3146 = vmatmul.mubr.f32.vlgmr.msra.gmra.mxu0 %v2291_v27 }
0x164c   :  { %v2388_v46 = vpop.f32.mrf.mxu1 }
0x164e   :  { %v3114_v19 = vpop.f32.mrf.mxu1 }
0x1654   :  { %v2545_v30 = vpop.f32.mrf.mxu1 }
0x1655   :  { %v2297_v1 = vpop.f32.mrf.mxu0 }
0x1656   :  { %v3136_v43 = vpop.f32.mrf.mxu1  ;;  %v2389_v36 = vadd.f32 %v2388_v46, %v2297_v1 }
0x1657   :  { %v3103_v40 = vpop.f32.mrf.mxu0 }
0x165d   :  { %v2468_v28 = vpop.f32.mrf.mxu0 }
0x165e   :  { %v2703_v33 = vpop.f32.mrf.mxu1  ;;  %v2469_v54 = vadd.f32 %v2468_v28, %v2389_v36 }
0x165f   :  { %v3125_v50 = vpop.f32.mrf.mxu0 }
0x1660   :  { %v3158_v25 = vpop.f32.mrf.mxu1  ;;  %v2546_v59 = vadd.f32 %v2545_v30, %v2469_v54 }
0x1666   :  { %v2628_v5 = vpop.f32.mrf.mxu0 }
0x1667   :  { %v2629_v6 = vadd.f32 %v2628_v5, %v2546_v59 }
0x1668   :  { %v3147_v39 = vpop.f32.mrf.mxu0 }
0x1669   :  { %v2704_v17 = vadd.f32 %v2703_v33, %v2629_v6 }
0x166b   :  { %v2707_v31 = vsel %vm533_vm4, %v2704_v17, %v4161_v53 }
0x166c   :  { %v2709_v35 = vsel %vm2708_vm12, %v2707_v31, 0.0 }
0x166d   :  { %2710 = vst [vmem:[%s4220_s8] sm:$0xff] %v2709_v35 }
0x166e   :  { %2715 = vsyncpa [#allocation3], 1 }
0x166f   :  { %2716 = vsyncpa [#allocation5], 1 }

</bundles_post_ra>
